<compile_context>
chip_gen: v6e
topology: v6e:2x2x1
jax: 0.10.0
libtpu: 0.0.40
codegen_flags: <defaults>
</compile_context>

<pallas_src>
import functools
import math

import jax
import jax.numpy as jnp
from jax import lax
from jax.experimental import pallas as pl
from jax.experimental.pallas import tpu as pltpu


# ------------------------- Fused GQA forward kernel --------------------------

def gqa_fused_kernel(q_ref, k_ref, v_ref,
                     wq_ref, bq_ref, wk_ref, bk_ref, wv_ref, bv_ref,
                     wo_ref, bo_ref,
                     out_ref, attn_ref,
                     *, num_heads, num_kv_heads, d_k, scale):
    """One program = one batch element; all heads processed here.

    q_ref/k_ref/v_ref : (S, d_model) f32
    w*_ref            : bf16 weights, b*_ref : (1, d_out) f32 biases
    out_ref           : (S, d_model) f32
    attn_ref          : (H, S, S) f32
    """
    group = num_heads // num_kv_heads

    # ---- fused input projections (bf16 MXU operands, f32 accumulate) ----
    q_in = q_ref[...].astype(jnp.bfloat16)
    k_in = k_ref[...].astype(jnp.bfloat16)
    v_in = v_ref[...].astype(jnp.bfloat16)

    # Pre-scale the whole query projection (bias included) by 1/sqrt(d_k):
    # equivalent to dividing the scores, but done on an (S, d_model) tile.
    qp = (jnp.dot(q_in, wq_ref[...], preferred_element_type=jnp.float32)
          + bq_ref[...]) * scale                                   # (S, D)
    kp = (jnp.dot(k_in, wk_ref[...], preferred_element_type=jnp.float32)
          + bk_ref[...])                                           # (S, d_kv)
    vp = (jnp.dot(v_in, wv_ref[...], preferred_element_type=jnp.float32)
          + bv_ref[...])                                           # (S, d_kv)

    qp_b = qp.astype(jnp.bfloat16)
    kp_b = kp.astype(jnp.bfloat16)
    vp_b = vp.astype(jnp.bfloat16)

    # ---- per-head attention (static unrolled loop; GQA sharing via slices) ----
    ctxs = []
    for h in range(num_heads):
        g = h // group                       # repeat_interleave semantics
        q_h = qp_b[:, h * d_k:(h + 1) * d_k]          # (S, d_k)
        k_h = kp_b[:, g * d_k:(g + 1) * d_k]          # (S, d_k), shared
        v_h = vp_b[:, g * d_k:(g + 1) * d_k]          # (S, d_k), shared

        # q_h @ k_h^T without materializing a transpose (contract last dims).
        scores = lax.dot_general(
            q_h, k_h, (((1,), (1,)), ((), ())),
            preferred_element_type=jnp.float32)        # (S, S) f32

        # numerically stable softmax, f32 math, EUP reciprocal
        m = jnp.max(scores, axis=-1, keepdims=True)
        e = jnp.exp(scores - m)
        denom = jnp.sum(e, axis=-1, keepdims=True)
        p = e * pl.reciprocal(denom, approx=True)      # (S, S) f32

        attn_ref[h] = p                                # required module output

        ctxs.append(jnp.dot(p.astype(jnp.bfloat16), v_h,
                            preferred_element_type=jnp.float32))  # (S, d_k)

    # Lane-dense (S, d_model) context, then output projection - all in-kernel.
    ctx = jnp.concatenate(ctxs, axis=-1)               # (S, D) f32
    out_ref[...] = (jnp.dot(ctx.astype(jnp.bfloat16), wo_ref[...],
                            preferred_element_type=jnp.float32)
                    + bo_ref[...])


def gqa_forward(q, k, v, wq, bq, wk, bk, wv, bv, wo, bo,
                *, num_heads, num_kv_heads):
    """q/k/v: (B, S, d_model) f32. Returns (out (B,S,D), attn (B,H,S,S))."""
    B, S, D = q.shape
    d_k = D // num_heads
    d_kv = d_k * num_kv_heads
    scale = 1.0 / math.sqrt(d_k)

    kernel = functools.partial(gqa_fused_kernel,
                               num_heads=num_heads,
                               num_kv_heads=num_kv_heads,
                               d_k=d_k, scale=scale)

    def full_spec(shape):
        # whole-array block; constant block index => DMA'd once, reused
        # across all B grid steps (weights/biases stay resident in VMEM).
        return pl.BlockSpec(shape, lambda b: (0,) * len(shape))

    out, attn = pl.pallas_call(
        kernel,
        out_shape=(
            jax.ShapeDtypeStruct((B, S, D), jnp.float32),
            jax.ShapeDtypeStruct((B, num_heads, S, S), jnp.float32),
        ),
        grid=(B,),
        in_specs=[
            pl.BlockSpec((None, S, D), lambda b: (b, 0, 0)),   # q
            pl.BlockSpec((None, S, D), lambda b: (b, 0, 0)),   # k
            pl.BlockSpec((None, S, D), lambda b: (b, 0, 0)),   # v
            full_spec((D, D)),    full_spec((1, D)),           # Wq, bq
            full_spec((D, d_kv)), full_spec((1, d_kv)),        # Wk, bk
            full_spec((D, d_kv)), full_spec((1, d_kv)),        # Wv, bv
            full_spec((D, D)),    full_spec((1, D)),           # Wo, bo
        ],
        out_specs=(
            pl.BlockSpec((None, S, D), lambda b: (b, 0, 0)),
            pl.BlockSpec((None, num_heads, S, S), lambda b: (b, 0, 0, 0)),
        ),
        compiler_params=pltpu.CompilerParams(
            dimension_semantics=("parallel",)),   # B programs -> multiple TCs
    )(q, k, v, wq, bq, wk, bk, wv, bv, wo, bo)
    return out, attn


# ------------------------------ Full GQA module ------------------------------

class GroupQueryAttentionPallas:
    def __init__(self, d_model=64, num_heads=8, num_kv_heads=2, key=None):
        assert d_model % num_heads == 0
        assert num_heads % num_kv_heads == 0
        self.d_model = d_model
        self.num_heads = num_heads
        self.num_kv_heads = num_kv_heads
        self.num_queries_per_kv = num_heads // num_kv_heads
        self.d_k = d_model // num_heads
        d_kv = d_model * num_kv_heads // num_heads

        if key is None:
            key = jax.random.PRNGKey(42)
        ks = jax.random.split(key, 8)

        def init_linear(kw, kb, d_in, d_out):
            bound = 1.0 / math.sqrt(d_in)
            w = jax.random.uniform(kw, (d_in, d_out), jnp.float32, -bound, bound)
            b = jax.random.uniform(kb, (d_out,), jnp.float32, -bound, bound)
            return w, b

        self.Wq, self.bq = init_linear(ks[0], ks[1], d_model, d_model)
        self.Wk, self.bk = init_linear(ks[2], ks[3], d_model, d_kv)
        self.Wv, self.bv = init_linear(ks[4], ks[5], d_model, d_kv)
        self.Wo, self.bo = init_linear(ks[6], ks[7], d_model, d_model)

        # bf16 MXU copies prepared ONCE (no per-call convert ops).
        self.Wq_b = self.Wq.astype(jnp.bfloat16)
        self.Wk_b = self.Wk.astype(jnp.bfloat16)
        self.Wv_b = self.Wv.astype(jnp.bfloat16)
        self.Wo_b = self.Wo.astype(jnp.bfloat16)
        self.bq2 = self.bq.reshape(1, d_model)
        self.bk2 = self.bk.reshape(1, d_kv)
        self.bv2 = self.bv.reshape(1, d_kv)
        self.bo2 = self.bo.reshape(1, d_model)

    def __call__(self, q, k, v):
        # q, k, v: (B, S, d_model) float32.  Single fused Pallas kernel;
        # no wrapper-side transposes / reshapes.
        return gqa_forward(
            q, k, v,
            self.Wq_b, self.bq2,
            self.Wk_b, self.bk2,
            self.Wv_b, self.bv2,
            self.Wo_b, self.bo2,
            num_heads=self.num_heads, num_kv_heads=self.num_kv_heads)


# ---------------------------------- Reference ---------------------------------

def reference_forward(module, q, k, v):
    """Pure-jnp f32 reference mirroring the PyTorch forward."""
    B, S, _ = q.shape
    H, Hkv, d_k = module.num_heads, module.num_kv_heads, module.d_k
    g = module.num_queries_per_kv

    q_p = q @ module.Wq + module.bq
    k_p = k @ module.Wk + module.bk
    v_p = v @ module.Wv + module.bv

    q_h = q_p.reshape(B, S, H, d_k).transpose(0, 2, 1, 3)
    k_h = k_p.reshape(B, S, Hkv, d_k).transpose(0, 2, 1, 3)
    v_h = v_p.reshape(B, S, Hkv, d_k).transpose(0, 2, 1, 3)

    k_r = jnp.repeat(k_h, g, axis=1)
    v_r = jnp.repeat(v_h, g, axis=1)

    scores = jnp.einsum("bhqd,bhkd->bhqk", q_h, k_r) / math.sqrt(d_k)
    attn = jax.nn.softmax(scores, axis=-1)
    ctx = jnp.einsum("bhqk,bhkd->bhqd", attn, v_r)
    ctx = ctx.transpose(0, 2, 1, 3).reshape(B, S, module.d_model)
    out = ctx @ module.Wo + module.bo
    return out, attn


# ------------------------------------ Main ------------------------------------

if __name__ == "__main__":
    B, S, D = 2, 8, 64   # batch, seq, d_model

    key = jax.random.PRNGKey(0)
    kq, kk, kv = jax.random.split(key, 3)
    q_in = jax.random.normal(kq, (B, S, D), jnp.float32)
    k_in = jax.random.normal(kk, (B, S, D), jnp.float32)
    v_in = jax.random.normal(kv, (B, S, D), jnp.float32)

    module = GroupQueryAttentionPallas(d_model=D, num_heads=8, num_kv_heads=2,
                                       key=jax.random.PRNGKey(123))

    out, attn = module(q_in, k_in, v_in)
    out = jax.block_until_ready(out)
    attn = jax.block_until_ready(attn)

    out_ref, attn_ref = reference_forward(module, q_in, k_in, v_in)
    assert out.shape == (B, S, D)
    assert attn.shape == (B, module.num_heads, S, S)
    # Tolerances loosened (vs pure-f32 path) for bf16 MXU operands + approx
    # reciprocal; accumulation is f32 so errors stay at the few-1e-3 level.
    assert jnp.allclose(out, out_ref, atol=3e-2, rtol=3e-2)
    assert jnp.allclose(attn, attn_ref, atol=2e-2, rtol=2e-2)

    print("KERNEL_OK")
</pallas_src>

<mosaic_0001>
module attributes {stable_mosaic.version = 11 : i64} {
  func.func @gqa_fused_kernel(%arg0: i32, %arg1: memref<1x8x64xf32, #tpu.memory_space<vmem>>, %arg2: memref<1x8x64xf32, #tpu.memory_space<vmem>>, %arg3: memref<1x8x64xf32, #tpu.memory_space<vmem>>, %arg4: memref<64x64xbf16, #tpu.memory_space<vmem>>, %arg5: memref<1x64xf32, #tpu.memory_space<vmem>>, %arg6: memref<64x16xbf16, #tpu.memory_space<vmem>>, %arg7: memref<1x16xf32, #tpu.memory_space<vmem>>, %arg8: memref<64x16xbf16, #tpu.memory_space<vmem>>, %arg9: memref<1x16xf32, #tpu.memory_space<vmem>>, %arg10: memref<64x64xbf16, #tpu.memory_space<vmem>>, %arg11: memref<1x64xf32, #tpu.memory_space<vmem>>, %arg12: memref<1x8x64xf32, #tpu.memory_space<vmem>>, %arg13: memref<1x8x8x8xf32, #tpu.memory_space<vmem>>) attributes {dimension_semantics = [#tpu.dimension_semantics<parallel>], iteration_bounds = array<i64: 2>, scalar_prefetch = 0 : i64, scratch_operands = 0 : i64, tpu.core_type = #tpu.core_type<tc>, window_params = [{transform_indices = @transform_0, window_bounds = array<i64: 1, 8, 64>}, {transform_indices = @transform_1, window_bounds = array<i64: 1, 8, 64>}, {transform_indices = @transform_2, window_bounds = array<i64: 1, 8, 64>}, {pipeline_mode = #tpu.pipeline_mode<synchronous>, transform_indices = @transform_3, window_bounds = array<i64: 64, 64>}, {pipeline_mode = #tpu.pipeline_mode<synchronous>, transform_indices = @transform_4, window_bounds = array<i64: 1, 64>}, {pipeline_mode = #tpu.pipeline_mode<synchronous>, transform_indices = @transform_5, window_bounds = array<i64: 64, 16>}, {pipeline_mode = #tpu.pipeline_mode<synchronous>, transform_indices = @transform_6, window_bounds = array<i64: 1, 16>}, {pipeline_mode = #tpu.pipeline_mode<synchronous>, transform_indices = @transform_7, window_bounds = array<i64: 64, 16>}, {pipeline_mode = #tpu.pipeline_mode<synchronous>, transform_indices = @transform_8, window_bounds = array<i64: 1, 16>}, {pipeline_mode = #tpu.pipeline_mode<synchronous>, transform_indices = @transform_9, window_bounds = array<i64: 64, 64>}, {pipeline_mode = #tpu.pipeline_mode<synchronous>, transform_indices = @transform_10, window_bounds = array<i64: 1, 64>}, {transform_indices = @transform_11, window_bounds = array<i64: 1, 8, 64>}, {transform_indices = @transform_12, window_bounds = array<i64: 1, 8, 8, 8>}]} {
    %c0 = arith.constant 0 : index
    %c0_0 = arith.constant 0 : index
    %c0_1 = arith.constant 0 : index
    %0 = vector.load %arg1[%c0, %c0_0, %c0_1] : memref<1x8x64xf32, #tpu.memory_space<vmem>>, vector<1x8x64xf32>
    %1 = vector.shape_cast %0 : vector<1x8x64xf32> to vector<8x64xf32>
    %2 = arith.truncf %1 : vector<8x64xf32> to vector<8x64xbf16>
    %c0_2 = arith.constant 0 : index
    %c0_3 = arith.constant 0 : index
    %c0_4 = arith.constant 0 : index
    %3 = vector.load %arg2[%c0_2, %c0_3, %c0_4] : memref<1x8x64xf32, #tpu.memory_space<vmem>>, vector<1x8x64xf32>
    %4 = vector.shape_cast %3 : vector<1x8x64xf32> to vector<8x64xf32>
    %5 = arith.truncf %4 : vector<8x64xf32> to vector<8x64xbf16>
    %c0_5 = arith.constant 0 : index
    %c0_6 = arith.constant 0 : index
    %c0_7 = arith.constant 0 : index
    %6 = vector.load %arg3[%c0_5, %c0_6, %c0_7] : memref<1x8x64xf32, #tpu.memory_space<vmem>>, vector<1x8x64xf32>
    %7 = vector.shape_cast %6 : vector<1x8x64xf32> to vector<8x64xf32>
    %8 = arith.truncf %7 : vector<8x64xf32> to vector<8x64xbf16>
    %c0_8 = arith.constant 0 : index
    %c0_9 = arith.constant 0 : index
    %9 = vector.load %arg4[%c0_8, %c0_9] : memref<64x64xbf16, #tpu.memory_space<vmem>>, vector<64x64xbf16>
    %cst = arith.constant dense<0.000000e+00> : vector<8x64xf32>
    %10 = tpu.matmul %2, %9, %cst {dimension_numbers = #tpu.dot_dimension_numbers<[1], [0], [0], [1], [0, 0, 1, 1], [], []>} : vector<8x64xbf16>, vector<64x64xbf16>, vector<8x64xf32> -> vector<8x64xf32>
    %c0_10 = arith.constant 0 : index
    %c0_11 = arith.constant 0 : index
    %11 = vector.load %arg5[%c0_10, %c0_11] : memref<1x64xf32, #tpu.memory_space<vmem>>, vector<1x64xf32>
    %12 = vector.broadcast %11 : vector<1x64xf32> to vector<8x64xf32>
    %13 = arith.addf %10, %12 : vector<8x64xf32>
    %cst_12 = arith.constant 0.353553385 : f32
    %14 = vector.broadcast %cst_12 : f32 to vector<8x64xf32>
    %15 = arith.mulf %13, %14 : vector<8x64xf32>
    %c0_13 = arith.constant 0 : index
    %c0_14 = arith.constant 0 : index
    %16 = vector.load %arg6[%c0_13, %c0_14] : memref<64x16xbf16, #tpu.memory_space<vmem>>, vector<64x16xbf16>
    %cst_15 = arith.constant dense<0.000000e+00> : vector<8x16xf32>
    %17 = tpu.matmul %5, %16, %cst_15 {dimension_numbers = #tpu.dot_dimension_numbers<[1], [0], [0], [1], [0, 0, 1, 1], [], []>} : vector<8x64xbf16>, vector<64x16xbf16>, vector<8x16xf32> -> vector<8x16xf32>
    %c0_16 = arith.constant 0 : index
    %c0_17 = arith.constant 0 : index
    %18 = vector.load %arg7[%c0_16, %c0_17] : memref<1x16xf32, #tpu.memory_space<vmem>>, vector<1x16xf32>
    %19 = vector.broadcast %18 : vector<1x16xf32> to vector<8x16xf32>
    %20 = arith.addf %17, %19 : vector<8x16xf32>
    %c0_18 = arith.constant 0 : index
    %c0_19 = arith.constant 0 : index
    %21 = vector.load %arg8[%c0_18, %c0_19] : memref<64x16xbf16, #tpu.memory_space<vmem>>, vector<64x16xbf16>
    %cst_20 = arith.constant dense<0.000000e+00> : vector<8x16xf32>
    %22 = tpu.matmul %8, %21, %cst_20 {dimension_numbers = #tpu.dot_dimension_numbers<[1], [0], [0], [1], [0, 0, 1, 1], [], []>} : vector<8x64xbf16>, vector<64x16xbf16>, vector<8x16xf32> -> vector<8x16xf32>
    %c0_21 = arith.constant 0 : index
    %c0_22 = arith.constant 0 : index
    %23 = vector.load %arg9[%c0_21, %c0_22] : memref<1x16xf32, #tpu.memory_space<vmem>>, vector<1x16xf32>
    %24 = vector.broadcast %23 : vector<1x16xf32> to vector<8x16xf32>
    %25 = arith.addf %22, %24 : vector<8x16xf32>
    %26 = arith.truncf %15 : vector<8x64xf32> to vector<8x64xbf16>
    %27 = arith.truncf %20 : vector<8x16xf32> to vector<8x16xbf16>
    %28 = arith.truncf %25 : vector<8x16xf32> to vector<8x16xbf16>
    %29 = vector.extract_strided_slice %26 {offsets = [0, 0], sizes = [8, 8], strides = [1, 1]} : vector<8x64xbf16> to vector<8x8xbf16>
    %30 = vector.extract_strided_slice %27 {offsets = [0, 0], sizes = [8, 8], strides = [1, 1]} : vector<8x16xbf16> to vector<8x8xbf16>
    %31 = vector.extract_strided_slice %28 {offsets = [0, 0], sizes = [8, 8], strides = [1, 1]} : vector<8x16xbf16> to vector<8x8xbf16>
    %cst_23 = arith.constant dense<0.000000e+00> : vector<8x8xf32>
    %32 = tpu.matmul %29, %30, %cst_23 {dimension_numbers = #tpu.dot_dimension_numbers<[1], [1], [0], [0], [0, 0, 1, 0], [], []>} : vector<8x8xbf16>, vector<8x8xbf16>, vector<8x8xf32> -> vector<8x8xf32>
    %cst_24 = arith.constant dense<0xFF800000> : vector<8xf32>
    %33 = vector.multi_reduction <maximumf>, %32, %cst_24 [1] : vector<8x8xf32> to vector<8xf32>
    %34 = vector.shape_cast %33 : vector<8xf32> to vector<8x1xf32>
    %35 = vector.broadcast %34 : vector<8x1xf32> to vector<8x8xf32>
    %36 = arith.subf %32, %35 : vector<8x8xf32>
    %37 = math.exp %36 : vector<8x8xf32>
    %cst_25 = arith.constant dense<0.000000e+00> : vector<8xf32>
    %38 = vector.multi_reduction <add>, %37, %cst_25 [1] : vector<8x8xf32> to vector<8xf32>
    %39 = vector.shape_cast %38 : vector<8xf32> to vector<8x1xf32>
    %40 = tpu.reciprocal %39 {approx = true} : vector<8x1xf32> -> vector<8x1xf32>
    %41 = vector.broadcast %40 : vector<8x1xf32> to vector<8x8xf32>
    %42 = arith.mulf %37, %41 : vector<8x8xf32>
    %c0_26 = arith.constant 0 : index
    %c0_27 = arith.constant 0 : index
    %c0_28 = arith.constant 0 : index
    %c0_29 = arith.constant 0 : index
    %43 = vector.load %arg13[%c0_26, %c0_27, %c0_28, %c0_29] : memref<1x8x8x8xf32, #tpu.memory_space<vmem>>, vector<1x1x8x8xf32>
    %44 = vector.shape_cast %43 : vector<1x1x8x8xf32> to vector<8x8xf32>
    %45 = vector.shape_cast %42 : vector<8x8xf32> to vector<1x1x8x8xf32>
    tpu.vector_store %arg13[%c0_26, %c0_27, %c0_28, %c0_29], %45 {strides = array<i32>} : memref<1x8x8x8xf32, #tpu.memory_space<vmem>>, vector<1x1x8x8xf32>,
    %46 = arith.truncf %42 : vector<8x8xf32> to vector<8x8xbf16>
    %cst_30 = arith.constant dense<0.000000e+00> : vector<8x8xf32>
    %47 = tpu.matmul %46, %31, %cst_30 {dimension_numbers = #tpu.dot_dimension_numbers<[1], [0], [0], [1], [0, 0, 1, 1], [], []>} : vector<8x8xbf16>, vector<8x8xbf16>, vector<8x8xf32> -> vector<8x8xf32>
    %48 = vector.extract_strided_slice %26 {offsets = [0, 8], sizes = [8, 8], strides = [1, 1]} : vector<8x64xbf16> to vector<8x8xbf16>
    %49 = vector.extract_strided_slice %27 {offsets = [0, 0], sizes = [8, 8], strides = [1, 1]} : vector<8x16xbf16> to vector<8x8xbf16>
    %50 = vector.extract_strided_slice %28 {offsets = [0, 0], sizes = [8, 8], strides = [1, 1]} : vector<8x16xbf16> to vector<8x8xbf16>
    %cst_31 = arith.constant dense<0.000000e+00> : vector<8x8xf32>
    %51 = tpu.matmul %48, %49, %cst_31 {dimension_numbers = #tpu.dot_dimension_numbers<[1], [1], [0], [0], [0, 0, 1, 0], [], []>} : vector<8x8xbf16>, vector<8x8xbf16>, vector<8x8xf32> -> vector<8x8xf32>
    %cst_32 = arith.constant dense<0xFF800000> : vector<8xf32>
    %52 = vector.multi_reduction <maximumf>, %51, %cst_32 [1] : vector<8x8xf32> to vector<8xf32>
    %53 = vector.shape_cast %52 : vector<8xf32> to vector<8x1xf32>
    %54 = vector.broadcast %53 : vector<8x1xf32> to vector<8x8xf32>
    %55 = arith.subf %51, %54 : vector<8x8xf32>
    %56 = math.exp %55 : vector<8x8xf32>
    %cst_33 = arith.constant dense<0.000000e+00> : vector<8xf32>
    %57 = vector.multi_reduction <add>, %56, %cst_33 [1] : vector<8x8xf32> to vector<8xf32>
    %58 = vector.shape_cast %57 : vector<8xf32> to vector<8x1xf32>
    %59 = tpu.reciprocal %58 {approx = true} : vector<8x1xf32> -> vector<8x1xf32>
    %60 = vector.broadcast %59 : vector<8x1xf32> to vector<8x8xf32>
    %61 = arith.mulf %56, %60 : vector<8x8xf32>
    %c0_34 = arith.constant 0 : index
    %c1 = arith.constant 1 : index
    %c0_35 = arith.constant 0 : index
    %c0_36 = arith.constant 0 : index
    %62 = vector.load %arg13[%c0_34, %c1, %c0_35, %c0_36] : memref<1x8x8x8xf32, #tpu.memory_space<vmem>>, vector<1x1x8x8xf32>
    %63 = vector.shape_cast %62 : vector<1x1x8x8xf32> to vector<8x8xf32>
    %64 = vector.shape_cast %61 : vector<8x8xf32> to vector<1x1x8x8xf32>
    tpu.vector_store %arg13[%c0_34, %c1, %c0_35, %c0_36], %64 {strides = array<i32>} : memref<1x8x8x8xf32, #tpu.memory_space<vmem>>, vector<1x1x8x8xf32>,
    %65 = arith.truncf %61 : vector<8x8xf32> to vector<8x8xbf16>
    %cst_37 = arith.constant dense<0.000000e+00> : vector<8x8xf32>
    %66 = tpu.matmul %65, %50, %cst_37 {dimension_numbers = #tpu.dot_dimension_numbers<[1], [0], [0], [1], [0, 0, 1, 1], [], []>} : vector<8x8xbf16>, vector<8x8xbf16>, vector<8x8xf32> -> vector<8x8xf32>
    %67 = vector.extract_strided_slice %26 {offsets = [0, 16], sizes = [8, 8], strides = [1, 1]} : vector<8x64xbf16> to vector<8x8xbf16>
    %68 = vector.extract_strided_slice %27 {offsets = [0, 0], sizes = [8, 8], strides = [1, 1]} : vector<8x16xbf16> to vector<8x8xbf16>
    %69 = vector.extract_strided_slice %28 {offsets = [0, 0], sizes = [8, 8], strides = [1, 1]} : vector<8x16xbf16> to vector<8x8xbf16>
    %cst_38 = arith.constant dense<0.000000e+00> : vector<8x8xf32>
    %70 = tpu.matmul %67, %68, %cst_38 {dimension_numbers = #tpu.dot_dimension_numbers<[1], [1], [0], [0], [0, 0, 1, 0], [], []>} : vector<8x8xbf16>, vector<8x8xbf16>, vector<8x8xf32> -> vector<8x8xf32>
    %cst_39 = arith.constant dense<0xFF800000> : vector<8xf32>
    %71 = vector.multi_reduction <maximumf>, %70, %cst_39 [1] : vector<8x8xf32> to vector<8xf32>
    %72 = vector.shape_cast %71 : vector<8xf32> to vector<8x1xf32>
    %73 = vector.broadcast %72 : vector<8x1xf32> to vector<8x8xf32>
    %74 = arith.subf %70, %73 : vector<8x8xf32>
    %75 = math.exp %74 : vector<8x8xf32>
    %cst_40 = arith.constant dense<0.000000e+00> : vector<8xf32>
    %76 = vector.multi_reduction <add>, %75, %cst_40 [1] : vector<8x8xf32> to vector<8xf32>
    %77 = vector.shape_cast %76 : vector<8xf32> to vector<8x1xf32>
    %78 = tpu.reciprocal %77 {approx = true} : vector<8x1xf32> -> vector<8x1xf32>
    %79 = vector.broadcast %78 : vector<8x1xf32> to vector<8x8xf32>
    %80 = arith.mulf %75, %79 : vector<8x8xf32>
    %c0_41 = arith.constant 0 : index
    %c2 = arith.constant 2 : index
    %c0_42 = arith.constant 0 : index
    %c0_43 = arith.constant 0 : index
    %81 = vector.load %arg13[%c0_41, %c2, %c0_42, %c0_43] : memref<1x8x8x8xf32, #tpu.memory_space<vmem>>, vector<1x1x8x8xf32>
    %82 = vector.shape_cast %81 : vector<1x1x8x8xf32> to vector<8x8xf32>
    %83 = vector.shape_cast %80 : vector<8x8xf32> to vector<1x1x8x8xf32>
    tpu.vector_store %arg13[%c0_41, %c2, %c0_42, %c0_43], %83 {strides = array<i32>} : memref<1x8x8x8xf32, #tpu.memory_space<vmem>>, vector<1x1x8x8xf32>,
    %84 = arith.truncf %80 : vector<8x8xf32> to vector<8x8xbf16>
    %cst_44 = arith.constant dense<0.000000e+00> : vector<8x8xf32>
    %85 = tpu.matmul %84, %69, %cst_44 {dimension_numbers = #tpu.dot_dimension_numbers<[1], [0], [0], [1], [0, 0, 1, 1], [], []>} : vector<8x8xbf16>, vector<8x8xbf16>, vector<8x8xf32> -> vector<8x8xf32>
    %86 = vector.extract_strided_slice %26 {offsets = [0, 24], sizes = [8, 8], strides = [1, 1]} : vector<8x64xbf16> to vector<8x8xbf16>
    %87 = vector.extract_strided_slice %27 {offsets = [0, 0], sizes = [8, 8], strides = [1, 1]} : vector<8x16xbf16> to vector<8x8xbf16>
    %88 = vector.extract_strided_slice %28 {offsets = [0, 0], sizes = [8, 8], strides = [1, 1]} : vector<8x16xbf16> to vector<8x8xbf16>
    %cst_45 = arith.constant dense<0.000000e+00> : vector<8x8xf32>
    %89 = tpu.matmul %86, %87, %cst_45 {dimension_numbers = #tpu.dot_dimension_numbers<[1], [1], [0], [0], [0, 0, 1, 0], [], []>} : vector<8x8xbf16>, vector<8x8xbf16>, vector<8x8xf32> -> vector<8x8xf32>
    %cst_46 = arith.constant dense<0xFF800000> : vector<8xf32>
    %90 = vector.multi_reduction <maximumf>, %89, %cst_46 [1] : vector<8x8xf32> to vector<8xf32>
    %91 = vector.shape_cast %90 : vector<8xf32> to vector<8x1xf32>
    %92 = vector.broadcast %91 : vector<8x1xf32> to vector<8x8xf32>
    %93 = arith.subf %89, %92 : vector<8x8xf32>
    %94 = math.exp %93 : vector<8x8xf32>
    %cst_47 = arith.constant dense<0.000000e+00> : vector<8xf32>
    %95 = vector.multi_reduction <add>, %94, %cst_47 [1] : vector<8x8xf32> to vector<8xf32>
    %96 = vector.shape_cast %95 : vector<8xf32> to vector<8x1xf32>
    %97 = tpu.reciprocal %96 {approx = true} : vector<8x1xf32> -> vector<8x1xf32>
    %98 = vector.broadcast %97 : vector<8x1xf32> to vector<8x8xf32>
    %99 = arith.mulf %94, %98 : vector<8x8xf32>
    %c0_48 = arith.constant 0 : index
    %c3 = arith.constant 3 : index
    %c0_49 = arith.constant 0 : index
    %c0_50 = arith.constant 0 : index
    %100 = vector.load %arg13[%c0_48, %c3, %c0_49, %c0_50] : memref<1x8x8x8xf32, #tpu.memory_space<vmem>>, vector<1x1x8x8xf32>
    %101 = vector.shape_cast %100 : vector<1x1x8x8xf32> to vector<8x8xf32>
    %102 = vector.shape_cast %99 : vector<8x8xf32> to vector<1x1x8x8xf32>
    tpu.vector_store %arg13[%c0_48, %c3, %c0_49, %c0_50], %102 {strides = array<i32>} : memref<1x8x8x8xf32, #tpu.memory_space<vmem>>, vector<1x1x8x8xf32>,
    %103 = arith.truncf %99 : vector<8x8xf32> to vector<8x8xbf16>
    %cst_51 = arith.constant dense<0.000000e+00> : vector<8x8xf32>
    %104 = tpu.matmul %103, %88, %cst_51 {dimension_numbers = #tpu.dot_dimension_numbers<[1], [0], [0], [1], [0, 0, 1, 1], [], []>} : vector<8x8xbf16>, vector<8x8xbf16>, vector<8x8xf32> -> vector<8x8xf32>
    %105 = vector.extract_strided_slice %26 {offsets = [0, 32], sizes = [8, 8], strides = [1, 1]} : vector<8x64xbf16> to vector<8x8xbf16>
    %106 = vector.extract_strided_slice %27 {offsets = [0, 8], sizes = [8, 8], strides = [1, 1]} : vector<8x16xbf16> to vector<8x8xbf16>
    %107 = vector.extract_strided_slice %28 {offsets = [0, 8], sizes = [8, 8], strides = [1, 1]} : vector<8x16xbf16> to vector<8x8xbf16>
    %cst_52 = arith.constant dense<0.000000e+00> : vector<8x8xf32>
    %108 = tpu.matmul %105, %106, %cst_52 {dimension_numbers = #tpu.dot_dimension_numbers<[1], [1], [0], [0], [0, 0, 1, 0], [], []>} : vector<8x8xbf16>, vector<8x8xbf16>, vector<8x8xf32> -> vector<8x8xf32>
    %cst_53 = arith.constant dense<0xFF800000> : vector<8xf32>
    %109 = vector.multi_reduction <maximumf>, %108, %cst_53 [1] : vector<8x8xf32> to vector<8xf32>
    %110 = vector.shape_cast %109 : vector<8xf32> to vector<8x1xf32>
    %111 = vector.broadcast %110 : vector<8x1xf32> to vector<8x8xf32>
    %112 = arith.subf %108, %111 : vector<8x8xf32>
    %113 = math.exp %112 : vector<8x8xf32>
    %cst_54 = arith.constant dense<0.000000e+00> : vector<8xf32>
    %114 = vector.multi_reduction <add>, %113, %cst_54 [1] : vector<8x8xf32> to vector<8xf32>
    %115 = vector.shape_cast %114 : vector<8xf32> to vector<8x1xf32>
    %116 = tpu.reciprocal %115 {approx = true} : vector<8x1xf32> -> vector<8x1xf32>
    %117 = vector.broadcast %116 : vector<8x1xf32> to vector<8x8xf32>
    %118 = arith.mulf %113, %117 : vector<8x8xf32>
    %c0_55 = arith.constant 0 : index
    %c4 = arith.constant 4 : index
    %c0_56 = arith.constant 0 : index
    %c0_57 = arith.constant 0 : index
    %119 = vector.load %arg13[%c0_55, %c4, %c0_56, %c0_57] : memref<1x8x8x8xf32, #tpu.memory_space<vmem>>, vector<1x1x8x8xf32>
    %120 = vector.shape_cast %119 : vector<1x1x8x8xf32> to vector<8x8xf32>
    %121 = vector.shape_cast %118 : vector<8x8xf32> to vector<1x1x8x8xf32>
    tpu.vector_store %arg13[%c0_55, %c4, %c0_56, %c0_57], %121 {strides = array<i32>} : memref<1x8x8x8xf32, #tpu.memory_space<vmem>>, vector<1x1x8x8xf32>,
    %122 = arith.truncf %118 : vector<8x8xf32> to vector<8x8xbf16>
    %cst_58 = arith.constant dense<0.000000e+00> : vector<8x8xf32>
    %123 = tpu.matmul %122, %107, %cst_58 {dimension_numbers = #tpu.dot_dimension_numbers<[1], [0], [0], [1], [0, 0, 1, 1], [], []>} : vector<8x8xbf16>, vector<8x8xbf16>, vector<8x8xf32> -> vector<8x8xf32>
    %124 = vector.extract_strided_slice %26 {offsets = [0, 40], sizes = [8, 8], strides = [1, 1]} : vector<8x64xbf16> to vector<8x8xbf16>
    %125 = vector.extract_strided_slice %27 {offsets = [0, 8], sizes = [8, 8], strides = [1, 1]} : vector<8x16xbf16> to vector<8x8xbf16>
    %126 = vector.extract_strided_slice %28 {offsets = [0, 8], sizes = [8, 8], strides = [1, 1]} : vector<8x16xbf16> to vector<8x8xbf16>
    %cst_59 = arith.constant dense<0.000000e+00> : vector<8x8xf32>
    %127 = tpu.matmul %124, %125, %cst_59 {dimension_numbers = #tpu.dot_dimension_numbers<[1], [1], [0], [0], [0, 0, 1, 0], [], []>} : vector<8x8xbf16>, vector<8x8xbf16>, vector<8x8xf32> -> vector<8x8xf32>
    %cst_60 = arith.constant dense<0xFF800000> : vector<8xf32>
    %128 = vector.multi_reduction <maximumf>, %127, %cst_60 [1] : vector<8x8xf32> to vector<8xf32>
    %129 = vector.shape_cast %128 : vector<8xf32> to vector<8x1xf32>
    %130 = vector.broadcast %129 : vector<8x1xf32> to vector<8x8xf32>
    %131 = arith.subf %127, %130 : vector<8x8xf32>
    %132 = math.exp %131 : vector<8x8xf32>
    %cst_61 = arith.constant dense<0.000000e+00> : vector<8xf32>
    %133 = vector.multi_reduction <add>, %132, %cst_61 [1] : vector<8x8xf32> to vector<8xf32>
    %134 = vector.shape_cast %133 : vector<8xf32> to vector<8x1xf32>
    %135 = tpu.reciprocal %134 {approx = true} : vector<8x1xf32> -> vector<8x1xf32>
    %136 = vector.broadcast %135 : vector<8x1xf32> to vector<8x8xf32>
    %137 = arith.mulf %132, %136 : vector<8x8xf32>
    %c0_62 = arith.constant 0 : index
    %c5 = arith.constant 5 : index
    %c0_63 = arith.constant 0 : index
    %c0_64 = arith.constant 0 : index
    %138 = vector.load %arg13[%c0_62, %c5, %c0_63, %c0_64] : memref<1x8x8x8xf32, #tpu.memory_space<vmem>>, vector<1x1x8x8xf32>
    %139 = vector.shape_cast %138 : vector<1x1x8x8xf32> to vector<8x8xf32>
    %140 = vector.shape_cast %137 : vector<8x8xf32> to vector<1x1x8x8xf32>
    tpu.vector_store %arg13[%c0_62, %c5, %c0_63, %c0_64], %140 {strides = array<i32>} : memref<1x8x8x8xf32, #tpu.memory_space<vmem>>, vector<1x1x8x8xf32>,
    %141 = arith.truncf %137 : vector<8x8xf32> to vector<8x8xbf16>
    %cst_65 = arith.constant dense<0.000000e+00> : vector<8x8xf32>
    %142 = tpu.matmul %141, %126, %cst_65 {dimension_numbers = #tpu.dot_dimension_numbers<[1], [0], [0], [1], [0, 0, 1, 1], [], []>} : vector<8x8xbf16>, vector<8x8xbf16>, vector<8x8xf32> -> vector<8x8xf32>
    %143 = vector.extract_strided_slice %26 {offsets = [0, 48], sizes = [8, 8], strides = [1, 1]} : vector<8x64xbf16> to vector<8x8xbf16>
    %144 = vector.extract_strided_slice %27 {offsets = [0, 8], sizes = [8, 8], strides = [1, 1]} : vector<8x16xbf16> to vector<8x8xbf16>
    %145 = vector.extract_strided_slice %28 {offsets = [0, 8], sizes = [8, 8], strides = [1, 1]} : vector<8x16xbf16> to vector<8x8xbf16>
    %cst_66 = arith.constant dense<0.000000e+00> : vector<8x8xf32>
    %146 = tpu.matmul %143, %144, %cst_66 {dimension_numbers = #tpu.dot_dimension_numbers<[1], [1], [0], [0], [0, 0, 1, 0], [], []>} : vector<8x8xbf16>, vector<8x8xbf16>, vector<8x8xf32> -> vector<8x8xf32>
    %cst_67 = arith.constant dense<0xFF800000> : vector<8xf32>
    %147 = vector.multi_reduction <maximumf>, %146, %cst_67 [1] : vector<8x8xf32> to vector<8xf32>
    %148 = vector.shape_cast %147 : vector<8xf32> to vector<8x1xf32>
    %149 = vector.broadcast %148 : vector<8x1xf32> to vector<8x8xf32>
    %150 = arith.subf %146, %149 : vector<8x8xf32>
    %151 = math.exp %150 : vector<8x8xf32>
    %cst_68 = arith.constant dense<0.000000e+00> : vector<8xf32>
    %152 = vector.multi_reduction <add>, %151, %cst_68 [1] : vector<8x8xf32> to vector<8xf32>
    %153 = vector.shape_cast %152 : vector<8xf32> to vector<8x1xf32>
    %154 = tpu.reciprocal %153 {approx = true} : vector<8x1xf32> -> vector<8x1xf32>
    %155 = vector.broadcast %154 : vector<8x1xf32> to vector<8x8xf32>
    %156 = arith.mulf %151, %155 : vector<8x8xf32>
    %c0_69 = arith.constant 0 : index
    %c6 = arith.constant 6 : index
    %c0_70 = arith.constant 0 : index
    %c0_71 = arith.constant 0 : index
    %157 = vector.load %arg13[%c0_69, %c6, %c0_70, %c0_71] : memref<1x8x8x8xf32, #tpu.memory_space<vmem>>, vector<1x1x8x8xf32>
    %158 = vector.shape_cast %157 : vector<1x1x8x8xf32> to vector<8x8xf32>
    %159 = vector.shape_cast %156 : vector<8x8xf32> to vector<1x1x8x8xf32>
    tpu.vector_store %arg13[%c0_69, %c6, %c0_70, %c0_71], %159 {strides = array<i32>} : memref<1x8x8x8xf32, #tpu.memory_space<vmem>>, vector<1x1x8x8xf32>,
    %160 = arith.truncf %156 : vector<8x8xf32> to vector<8x8xbf16>
    %cst_72 = arith.constant dense<0.000000e+00> : vector<8x8xf32>
    %161 = tpu.matmul %160, %145, %cst_72 {dimension_numbers = #tpu.dot_dimension_numbers<[1], [0], [0], [1], [0, 0, 1, 1], [], []>} : vector<8x8xbf16>, vector<8x8xbf16>, vector<8x8xf32> -> vector<8x8xf32>
    %162 = vector.extract_strided_slice %26 {offsets = [0, 56], sizes = [8, 8], strides = [1, 1]} : vector<8x64xbf16> to vector<8x8xbf16>
    %163 = vector.extract_strided_slice %27 {offsets = [0, 8], sizes = [8, 8], strides = [1, 1]} : vector<8x16xbf16> to vector<8x8xbf16>
    %164 = vector.extract_strided_slice %28 {offsets = [0, 8], sizes = [8, 8], strides = [1, 1]} : vector<8x16xbf16> to vector<8x8xbf16>
    %cst_73 = arith.constant dense<0.000000e+00> : vector<8x8xf32>
    %165 = tpu.matmul %162, %163, %cst_73 {dimension_numbers = #tpu.dot_dimension_numbers<[1], [1], [0], [0], [0, 0, 1, 0], [], []>} : vector<8x8xbf16>, vector<8x8xbf16>, vector<8x8xf32> -> vector<8x8xf32>
    %cst_74 = arith.constant dense<0xFF800000> : vector<8xf32>
    %166 = vector.multi_reduction <maximumf>, %165, %cst_74 [1] : vector<8x8xf32> to vector<8xf32>
    %167 = vector.shape_cast %166 : vector<8xf32> to vector<8x1xf32>
    %168 = vector.broadcast %167 : vector<8x1xf32> to vector<8x8xf32>
    %169 = arith.subf %165, %168 : vector<8x8xf32>
    %170 = math.exp %169 : vector<8x8xf32>
    %cst_75 = arith.constant dense<0.000000e+00> : vector<8xf32>
    %171 = vector.multi_reduction <add>, %170, %cst_75 [1] : vector<8x8xf32> to vector<8xf32>
    %172 = vector.shape_cast %171 : vector<8xf32> to vector<8x1xf32>
    %173 = tpu.reciprocal %172 {approx = true} : vector<8x1xf32> -> vector<8x1xf32>
    %174 = vector.broadcast %173 : vector<8x1xf32> to vector<8x8xf32>
    %175 = arith.mulf %170, %174 : vector<8x8xf32>
    %c0_76 = arith.constant 0 : index
    %c7 = arith.constant 7 : index
    %c0_77 = arith.constant 0 : index
    %c0_78 = arith.constant 0 : index
    %176 = vector.load %arg13[%c0_76, %c7, %c0_77, %c0_78] : memref<1x8x8x8xf32, #tpu.memory_space<vmem>>, vector<1x1x8x8xf32>
    %177 = vector.shape_cast %176 : vector<1x1x8x8xf32> to vector<8x8xf32>
    %178 = vector.shape_cast %175 : vector<8x8xf32> to vector<1x1x8x8xf32>
    tpu.vector_store %arg13[%c0_76, %c7, %c0_77, %c0_78], %178 {strides = array<i32>} : memref<1x8x8x8xf32, #tpu.memory_space<vmem>>, vector<1x1x8x8xf32>,
    %179 = arith.truncf %175 : vector<8x8xf32> to vector<8x8xbf16>
    %cst_79 = arith.constant dense<0.000000e+00> : vector<8x8xf32>
    %180 = tpu.matmul %179, %164, %cst_79 {dimension_numbers = #tpu.dot_dimension_numbers<[1], [0], [0], [1], [0, 0, 1, 1], [], []>} : vector<8x8xbf16>, vector<8x8xbf16>, vector<8x8xf32> -> vector<8x8xf32>
    %181 = tpu.concatenate %47, %66, %85, %104, %123, %142, %161, %180 in 1 : vector<8x8xf32>, vector<8x8xf32>, vector<8x8xf32>, vector<8x8xf32>, vector<8x8xf32>, vector<8x8xf32>, vector<8x8xf32>, vector<8x8xf32> -> vector<8x64xf32>
    %182 = arith.truncf %181 : vector<8x64xf32> to vector<8x64xbf16>
    %c0_80 = arith.constant 0 : index
    %c0_81 = arith.constant 0 : index
    %183 = vector.load %arg10[%c0_80, %c0_81] : memref<64x64xbf16, #tpu.memory_space<vmem>>, vector<64x64xbf16>
    %cst_82 = arith.constant dense<0.000000e+00> : vector<8x64xf32>
    %184 = tpu.matmul %182, %183, %cst_82 {dimension_numbers = #tpu.dot_dimension_numbers<[1], [0], [0], [1], [0, 0, 1, 1], [], []>} : vector<8x64xbf16>, vector<64x64xbf16>, vector<8x64xf32> -> vector<8x64xf32>
    %c0_83 = arith.constant 0 : index
    %c0_84 = arith.constant 0 : index
    %185 = vector.load %arg11[%c0_83, %c0_84] : memref<1x64xf32, #tpu.memory_space<vmem>>, vector<1x64xf32>
    %186 = vector.broadcast %185 : vector<1x64xf32> to vector<8x64xf32>
    %187 = arith.addf %184, %186 : vector<8x64xf32>
    %c0_85 = arith.constant 0 : index
    %c0_86 = arith.constant 0 : index
    %c0_87 = arith.constant 0 : index
    %188 = vector.load %arg12[%c0_85, %c0_86, %c0_87] : memref<1x8x64xf32, #tpu.memory_space<vmem>>, vector<1x8x64xf32>
    %189 = vector.shape_cast %188 : vector<1x8x64xf32> to vector<8x64xf32>
    %190 = vector.shape_cast %187 : vector<8x64xf32> to vector<1x8x64xf32>
    tpu.vector_store %arg12[%c0_85, %c0_86, %c0_87], %190 {strides = array<i32>} : memref<1x8x64xf32, #tpu.memory_space<vmem>>, vector<1x8x64xf32>,
    return
  }
  func.func @transform_0(%arg0: i32) -> (i32, i32, i32) {
    %c0_i32 = arith.constant 0 : i32
    %c0_i32_0 = arith.constant 0 : i32
    %c0_i32_1 = arith.constant 0 : i32
    return %arg0, %c0_i32, %c0_i32_0 : i32, i32, i32
  }
  func.func @transform_1(%arg0: i32) -> (i32, i32, i32) {
    %c0_i32 = arith.constant 0 : i32
    %c0_i32_0 = arith.constant 0 : i32
    %c0_i32_1 = arith.constant 0 : i32
    return %arg0, %c0_i32, %c0_i32_0 : i32, i32, i32
  }
  func.func @transform_2(%arg0: i32) -> (i32, i32, i32) {
    %c0_i32 = arith.constant 0 : i32
    %c0_i32_0 = arith.constant 0 : i32
    %c0_i32_1 = arith.constant 0 : i32
    return %arg0, %c0_i32, %c0_i32_0 : i32, i32, i32
  }
  func.func @transform_3(%arg0: i32) -> (i32, i32) {
    %c0_i32 = arith.constant 0 : i32
    %c0_i32_0 = arith.constant 0 : i32
    %c0_i32_1 = arith.constant 0 : i32
    return %c0_i32, %c0_i32_0 : i32, i32
  }
  func.func @transform_4(%arg0: i32) -> (i32, i32) {
    %c0_i32 = arith.constant 0 : i32
    %c0_i32_0 = arith.constant 0 : i32
    %c0_i32_1 = arith.constant 0 : i32
    return %c0_i32, %c0_i32_0 : i32, i32
  }
  func.func @transform_5(%arg0: i32) -> (i32, i32) {
    %c0_i32 = arith.constant 0 : i32
    %c0_i32_0 = arith.constant 0 : i32
    %c0_i32_1 = arith.constant 0 : i32
    return %c0_i32, %c0_i32_0 : i32, i32
  }
  func.func @transform_6(%arg0: i32) -> (i32, i32) {
    %c0_i32 = arith.constant 0 : i32
    %c0_i32_0 = arith.constant 0 : i32
    %c0_i32_1 = arith.constant 0 : i32
    return %c0_i32, %c0_i32_0 : i32, i32
  }
  func.func @transform_7(%arg0: i32) -> (i32, i32) {
    %c0_i32 = arith.constant 0 : i32
    %c0_i32_0 = arith.constant 0 : i32
    %c0_i32_1 = arith.constant 0 : i32
    return %c0_i32, %c0_i32_0 : i32, i32
  }
  func.func @transform_8(%arg0: i32) -> (i32, i32) {
    %c0_i32 = arith.constant 0 : i32
    %c0_i32_0 = arith.constant 0 : i32
    %c0_i32_1 = arith.constant 0 : i32
    return %c0_i32, %c0_i32_0 : i32, i32
  }
  func.func @transform_9(%arg0: i32) -> (i32, i32) {
    %c0_i32 = arith.constant 0 : i32
    %c0_i32_0 = arith.constant 0 : i32
    %c0_i32_1 = arith.constant 0 : i32
    return %c0_i32, %c0_i32_0 : i32, i32
  }
  func.func @transform_10(%arg0: i32) -> (i32, i32) {
    %c0_i32 = arith.constant 0 : i32
    %c0_i32_0 = arith.constant 0 : i32
    %c0_i32_1 = arith.constant 0 : i32
    return %c0_i32, %c0_i32_0 : i32, i32
  }
  func.func @transform_11(%arg0: i32) -> (i32, i32, i32) {
    %c0_i32 = arith.constant 0 : i32
    %c0_i32_0 = arith.constant 0 : i32
    %c0_i32_1 = arith.constant 0 : i32
    return %arg0, %c0_i32, %c0_i32_0 : i32, i32, i32
  }
  func.func @transform_12(%arg0: i32) -> (i32, i32, i32, i32) {
    %c0_i32 = arith.constant 0 : i32
    %c0_i32_0 = arith.constant 0 : i32
    %c0_i32_1 = arith.constant 0 : i32
    %c0_i32_2 = arith.constant 0 : i32
    return %arg0, %c0_i32, %c0_i32_0, %c0_i32_1 : i32, i32, i32, i32
  }
}

</mosaic_0001>

<bundles_post_ra>
// kernel: tpu_custom_call.1
= control target key start
LH: loop header
LB: loop body
LE: loop exit
PB: predicated region body
PF: predicated region fallthrough
CT: control target
= control target key end

     0   :  { %s2983_s0 = inlined_call_operand.vmem [shape: f32[2,8,64], index: 0, kind: input, shape index: {}]   ;;  %s2984_s1 = inlined_call_operand.hbm [shape: f32[2,8,64], index: 1, kind: input, shape index: {}]   ;;  %s2985_s2 = inlined_call_operand.hbm [shape: f32[2,8,64], index: 2, kind: input, shape index: {}]   ;;  %s2986_s3 = inlined_call_operand.vmem [shape: bf16[64,64], index: 3, kind: input, shape index: {}]   ;;  %s2987_s4 = inlined_call_operand.vmem [shape: f32[1,64], index: 4, kind: input, shape index: {}]   ;;  %s2988_s5 = inlined_call_operand.vmem [shape: bf16[64,16], index: 5, kind: input, shape index: {}]   ;;  %s2989_s6 = inlined_call_operand.vmem [shape: f32[1,16], index: 6, kind: input, shape index: {}]   ;;  %s2990_s7 = inlined_call_operand.vmem [shape: bf16[64,16], index: 7, kind: input, shape index: {}]   ;;  %s2991_s8 = inlined_call_operand.vmem [shape: f32[1,16], index: 8, kind: input, shape index: {}]   ;;  %s2992_s9 = inlined_call_operand.vmem [shape: bf16[64,64], index: 9, kind: input, shape index: {}]   ;;  %s2993_s10 = inlined_call_operand.vmem [shape: f32[1,64], index: 10, kind: input, shape index: {}]   ;;  %s2994_s11 = inlined_call_operand.hbm [shape: f32[2,8,64], index: 11, kind: output, shape index: {0}]   ;;  %s2995_s12 = inlined_call_operand.hbm [shape: f32[2,8,8,8], index: 12, kind: output, shape index: {1}]  }
   0x1   :  { %3005 = sst [smem:[#allocation19_spill]] %s2984_s1 }
   0x2   :  { %18 = vsyncpa [#allocation3], 0 }
   0x3   :  { %20 = vsyncpa [#allocation3 + $0x1], 0 }
   0x4   :  { %21 = vsyncpa [#allocation6], 0 }
   0x5   :  { %23 = vsyncpa [#allocation6 + $0x1], 0 }
   0x6   :  { %24 = vsyncpa [#allocation4], 0 }
   0x7   :  { %26 = vsyncpa [#allocation4 + $0x1], 0 }
   0x8   :  { %27 = vsyncpa [#allocation9], 0 }
   0x9   :  { %29 = vsyncpa [#allocation9 + $0x1], 0  ;;  %s2510_s21 = smov 0   ;;  %s2512_s22 = smov 0  }
   0xa   :  { %s2514_s23 = smov 0   ;;  %s2516_s24 = smov 0  }
   0xb LB: > { %3006 = sst [smem:[#allocation14_spill]] %s2410_s21  ;;  %s2531_s25 = sadd.s32 4294967295, %s2422_s24   ;;  %s2422_s24 = sphi %s2516_s24, %s3029_s24   ;;  %s2418_s23 = sphi %s2514_s23, %s3031_s23   ;;  %s2414_s22 = sphi %s2512_s22, %s3033_s22   ;;  %s2410_s21 = sphi %s2510_s21, %s3032_s21  }
   0xc   : > { %3007 = sst [smem:[#allocation15_spill]] %s2418_s23  ;;  %s1883_s26 = sadd.s32 4294967294, %s2422_s24  }
   0xd   : > { %s2535_s27 = sadd.s32 1, %s2422_s24   ;;  %s68_s28 = sadd.s32 1, %s2418_s23 }
   0xe   : > { %3008 = sst [smem:[#allocation16_spill]] %s2535_s27  ;;  %s65_s29 = ssub.s32 %s2422_s24, %s2535_s27 }
   0xf   : > { %p75_p0 = scmp.ne.s32.totalorder %s2418_s23, %s2414_s22  ;;  %p66_p1 = scmp.eq.s32.totalorder %s65_s29, 0 }
  0x10   : > { %p76_p2 = scmp.eq.s32.totalorder %s2422_s24, 0  ;;  %p81_p3 = scmp.ne.s32.totalorder %s2414_s22, %s2410_s21 }
  0x11   : > { %p82_p4 = scmp.eq.s32.totalorder %s2531_s25, 0  ;;  %p299_p7 = scmp.eq.s32.totalorder %s2531_s25, 1 }
  0x12   : > { %s2547_s30 = scalar_select %p66_p1, %s2418_s23, %s68_s28  }
  0x13   : > { %p2549_p5 = por %p76_p2, %p75_p0  ;;  %p2553_p6 = por %p82_p4, %p81_p3 }
  0x14   : > { %3009 = sst [smem:[#allocation17_spill]] %s2547_s30  ;;  %p305_p8 = scmp.eq.s32.totalorder %s1883_s26, 1 }
  0x15   : > { %s3011_s14 = scalar_select %p2553_p6, 1, 0 }
  0x16   : > { %p2169_p10 = scmp.lt.s32.totalorder %s2422_s24, 2  ;;  %p2560_p11 = por %p299_p7, %p75_p0 }
  0x17   : > { %p2564_p12 = por %p305_p8, %p81_p3  ;;  %s2569_s17 = sand.u32 1, %s2418_s23  }
  0x18   : > { %s3012_s15 = scalar_select %p2560_p11, 1, 0 }
  0x19   : > { %s3013_s16 = scalar_select %p2564_p12, 1, 0 }
  0x1a   : > { %s2998_s18 = sshll.u32 %s2422_s24, 7  ;;  %s2997_s19 = sshll.u32 %s2569_s17, 3 }
  0x1b   : > { %3014 = sst [smem:[#allocation18_spill]] %s3013_s16  ;;  %s386_s29 = scalar_lea.vmem [#allocation2], %s2997_s19 }
  0x1c   : > { %s3015_s1 = sld [smem:[#allocation19_spill]]  ;;  %s393_s30 = sshll.u32 %s386_s29, 4  ;;  %s2588_s30 = int_to_ptr.vmem [resolvable:$true] %s393_s30 }
  0x1d   : > { %p2584_p13 = pnand %p2169_p10, %p2549_p5  ;;  %s383_s20 = scalar_lea.sflag [#allocation3], %s2569_s17 }
  0x1f   : > { %p2270_p3 = pneg %p2584_p13 }
  0x22   : > { %s2578_s28 = scalar_lea.hbm %s3015_s1, %s2998_s18  ;;  %s2273_s19 = scalar_lea.hbm %s3015_s1, 256 }
  0x23   : > { %s2268_s26 = scalar_lea.hbm %s2578_s28, 128  ;;  %p2274_p5 = scmp.lt.s32.totalorder %s2578_s28, %s3015_s1 }
  0x24   : > { %p2269_p2 = scmp.ne.s32.totalorder %s2578_s28, %s2268_s26  ;;  %p2275_p8 = scmp.lt.s32.totalorder %s2273_s19, %s2268_s26 }
  0x26   : > { %p2271_p4 = pnand %p2270_p3, %p2269_p2  ;;  %p2276_p10 = por %p2275_p8, %p2274_p5 }
  0x28   : > { %p2272_p7 = pneg %p2271_p4 }
  0x2a   : > { %p2277_p9 = pnand %p2276_p10, %p2272_p7 }
  0x2c   : > { %2280 = shalt.err (!%p2277_p9)
}
  0x2d   : > { %s2281_s16 = scalar_lea.vmem %s2588_s30, 128  ;;  %s2424_s13 = smov [#allocation2]  }
  0x2e   : > { %p2282_p0 = scmp.ne.s32.totalorder %s2588_s30, %s2281_s16  ;;  %s2286_s29 = sshll.u32 %s2424_s13, 4  ;;  %s2287_s29 = int_to_ptr.vmem [resolvable:$false] %s2286_s29 }
  0x2f   : > { %s2288_s21 = scalar_lea.vmem %s2287_s29, 256  ;;  %p2289_p1 = scmp.lt.s32.totalorder %s2588_s30, %s2287_s29 }
  0x30   : > { %p2284_p2 = pnand %p2282_p0, %p2270_p3  ;;  %p2290_p12 = scmp.lt.s32.totalorder %s2288_s21, %s2281_s16 }
  0x32   : > { %p2285_p4 = pneg %p2284_p2  ;;  %p2291_p11 = por %p2290_p12, %p2289_p1 }
  0x34   : > { %p2292_p5 = pnand %p2291_p11, %p2285_p4 }
  0x36   : > { %2295 = shalt.err (!%p2292_p5)
}
  0x37   : > { %2158 = dma.hbm_to_vmem [thread:$0]  (!%p2584_p13), %s2578_s28, 128, %s2588_s30, %s383_s20  }
  0x38   : > { %p3017_p9 = scmp.lt.s32.totalorder %s2422_s24, 3  ;;  %p3018_p0 = scmp.ge.s32.totalorder %s2422_s24, 1 }
  0x39   : > { %s3020_s21 = sshll.u32 %s2422_s24, 7  ;;  %s3021_s26 = sshll.u32 %s2569_s17, 3 }
  0x3a   : > { %p2621_p7 = pnand %p3018_p0, %p3017_p9  ;;  %s2630_s19 = scalar_lea.hbm %s2985_s2, %s3020_s21 }
  0x3b   : > { %s404_s13 = scalar_lea.vmem [#allocation5], %s3021_s26  ;;  %s401_s30 = scalar_lea.sflag [#allocation6], %s2569_s17 }
  0x3c   : > { %s3019_s27 = scalar_select %p2621_p7, 1, 0 }
  0x3d   : > { %s411_s29 = sshll.u32 %s404_s13, 4  ;;  %s2296_s28 = scalar_lea.hbm %s2630_s19, 128  ;;  %s412_s29 = int_to_ptr.vmem [resolvable:$true] %s411_s29 }
  0x3e   : > { %p2297_p11 = scmp.ne.s32.totalorder %s2630_s19, %s2296_s28  ;;  %s2301_s16 = scalar_lea.hbm %s2985_s2, 256 }
  0x3f   : > { %p2302_p8 = scmp.lt.s32.totalorder %s2630_s19, %s2985_s2  ;;  %p2303_p10 = scmp.lt.s32.totalorder %s2301_s16, %s2296_s28 }
  0x40   : > { %p2299_p12 = pnand %p2297_p11, %p2270_p3 }
  0x41   : > { %p2304_p2 = por %p2303_p10, %p2302_p8 }
  0x42   : > { %p2300_p1 = pneg %p2299_p12 }
  0x44   : > { %p2305_p4 = pnand %p2304_p2, %p2300_p1 }
  0x46   : > { %2308 = shalt.err (!%p2305_p4)
}
  0x47   : > { %s2309_s26 = scalar_lea.vmem %s412_s29, 128  ;;  %s2425_s17 = smov [#allocation5]  }
  0x48   : > { %p2310_p5 = scmp.ne.s32.totalorder %s412_s29, %s2309_s26  ;;  %s2314_s13 = sshll.u32 %s2425_s17, 4  ;;  %s2315_s13 = int_to_ptr.vmem [resolvable:$false] %s2314_s13 }
  0x49   : > { %s2316_s1 = scalar_lea.vmem %s2315_s13, 256  ;;  %p2317_p11 = scmp.lt.s32.totalorder %s412_s29, %s2315_s13 }
  0x4a   : > { %p2312_p9 = pnand %p2310_p5, %p2270_p3  ;;  %p2318_p12 = scmp.lt.s32.totalorder %s2316_s1, %s2309_s26 }
  0x4c   : > { %p2313_p0 = pneg %p2312_p9  ;;  %p2319_p6 = por %p2318_p12, %p2317_p11 }
  0x4e   : > { %p2320_p7 = pnand %p2319_p6, %p2313_p0 }
  0x50   : > { %2323 = shalt.err (!%p2320_p7)
}
  0x51   : > { %2161 = dma.hbm_to_vmem [thread:$0]  (!%p2584_p13), %s2630_s19, 128, %s412_s29, %s401_s30  }
  0x52   : > { %p3022_p1 = scmp.ne.s32.totalorder %s3019_s27, 0 }
  0x53   : > { %s2656_s28 = sand.u32 (!%p3022_p1), 1, %s2414_s22   ;;  %p3023_p6 = scmp.ne.s32.totalorder (!%p3022_p1), %s3011_s14, 0 }
  0x54   : > { %420 = sbr.rel (%p3022_p1) target bundleno = 1905 (0x771), region = 64  ;;  %s2659_s20 = sshll.u32 (!%p3022_p1), %s2656_s28, 3 }
  0x55   : > { %s423_s16 = scalar_lea.sflag (!%p3022_p1), [#allocation3], %s2656_s28  ;;  %s426_s21 = scalar_lea.vmem (!%p3022_p1), [#allocation2], %s2659_s20 }
  0x59   : > { %2393 = dma.done.wait (%p3023_p6), %s423_s16, 128  }
  0x5a   : > { %2395 = vsyncadd (%p3023_p6), %s423_s16, 4294967168  ;;  %s432_s23 = scalar_lea.sflag [#allocation6], %s2656_s28  ;;  %s435_s27 = scalar_lea.vmem [#allocation5], %s2659_s20 }
  0x5b   : > { %2397 = dma.done.wait (%p3023_p6), %s432_s23, 128  }
  0x5c   : > { %2399 = vsyncadd (%p3023_p6), %s432_s23, 4294967168  ;;  %v2426_v0 = vmov 0.0   ;;  %vm2427_vm0 = vmmov 0   ;;  %p490_p13 = scmp.lt.s32.totalorder %s2531_s25, 1  ;;  %v2220_v1 = vld [vmem:[%s2986_s3 + $0x18] sm:$0xff]   ;;  %v2222_v3 = vld [vmem:[%s2986_s3 + $0x10] sm:$0xff]  }
  0x5d   : > { %2003 = vmatprep.subr.bf16.mxu0 %v2426_v0  ;;  %2015 = vmatprep.subr.bf16.mxu1 %v2426_v0  ;;  %v2221_v2 = vld [vmem:[%s2988_s5 + $0x18] sm:$0xff]   ;;  %v2223_v4 = vld [vmem:[%s2988_s5 + $0x10] sm:$0xff]   ;;  %v2224_v5 = vld [vmem:[%s2986_s3 + $0x8] sm:$0xff]   ;;  %vm540_vm1 = vcmask 523264   ;;  %vm752_vm2 = vcmask 64512   ;;  %s2430_s19 = smov 96  }
  0x5e   : > { %2011 = vmatprep.mubr.msk.bf16.mxu0 %vm2427_vm0, %v2426_v0  ;;  %2023 = vmatprep.mubr.msk.bf16.mxu1 %vm2427_vm0, %v2426_v0  ;;  %s491_s14 = scalar_select %p490_p13, %s2531_s25, 1  ;;  %v2225_v6 = vld [vmem:[%s2988_s5 + $0x8] sm:$0xff]   ;;  %v2226_v7 = vld [vmem:[%s2986_s3] sm:$0xff]   ;;  %v2228_v11 = vld [vmem:[%s2990_s7 + $0x18] sm:$0xff]   ;;  %vm815_vm3 = vcmask 1043456   ;;  %vm1615_vm4 = vcmask 130048  }
  0x5f   : > { %2004 = vmatpush3.bf16.msra.mxu0 %v2220_v1  ;;  %2016 = vmatpush3.bf16.msra.mxu1 %v2221_v2  ;;  %v2227_v9 = vld [vmem:[%s2988_s5] sm:$0xff]   ;;  %v2229_v14 = vld [vmem:[%s2990_s7 + $0x10] sm:$0xff]   ;;  %v2230_v15 = vld [vmem:[%s2990_s7 + $0x8] sm:$0xff]   ;;  %s2432_s29 = smov 80   ;;  %s2433_s30 = smov 72   ;;  %vm1617_vm5 = vcmask 195584  }
  0x60   : > { %2005 = vmatprep.subr.bf16.mxu0 %v2426_v0  ;;  %2017 = vmatprep.subr.bf16.mxu1 %v2426_v0  ;;  %s1895_s16 = sshll.u32 %s491_s14, 3  ;;  %v497_v10 = vld [vmem:[%s426_s21] sm:$0xff]  ;;  %v499_v17 = vld [vmem:[%s435_s27] sm:$0xff]  ;;  %s2428_s27 = smov 120   ;;  %vm1619_vm6 = vcmask 261120   ;;  %vm1621_vm7 = vcmask 326656  }
  0x61   : > { %s493_s17 = scalar_lea.vmem %s2983_s0, %s1895_s16  ;;  %v498_v13 = vpack.c.bf16 %v497_v10, %v497_v10  ;;  %v2231_v16 = vld [vmem:[%s2990_s7] sm:$0xff]   ;;  %v500_v18 = vpack.c.bf16 %v499_v17, %v499_v17  ;;  %s2429_s16 = smov 112   ;;  %vm1623_vm8 = vcmask 392192   ;;  %vm1625_vm9 = vcmask 457728  }
  0x62   : > { %v495_v8 = vld [vmem:[%s493_s17] sm:$0xff]  ;;  %s2431_s21 = smov 88   ;;  %s2434_s17 = smov 104  }
  0x63   : > { %2006 = vmatpush3.bf16.msra.mxu0 %v2222_v3  ;;  %2018 = vmatpush3.bf16.msra.mxu1 %v2223_v4  ;;  %v496_v12 = vpack.c.bf16 %v495_v8, %v495_v8  ;;  %v1896_v19 = vld [vmem:[%s2987_s4] ss:$0 sm:$0xff]  ;;  %s1894_s13 = sshll.u32 %s2656_s28, 6  ;;  %s2435_s1 = smov 8  }
  0x64   : > { %2007 = vmatprep.subr.bf16.mxu0 %v2426_v0  ;;  %2019 = vmatprep.subr.bf16.mxu1 %v2426_v0  ;;  %v1902_v20 = vld [vmem:[%s2989_s6] ss:$0 sm:$0xff]  ;;  %s2795_s14 = scalar_lea.vmem [#allocation8], %s1894_s13  ;;  %s2436_s23 = smov 16  }
  0x65   : > { %v1908_v35 = vld [vmem:[%s2991_s8] ss:$0 sm:$0xff]  ;;  %s1717_s26 = scalar_lea.sflag [#allocation9], %s2656_s28  ;;  %p3024_p7 = scmp.ne.s32.totalorder %s3012_s15, 0 }
  0x66   : > { %s2442_s13 = smov [#allocation8]  }
  0x67   : > { %2008 = vmatpush3.bf16.msra.mxu0 %v2224_v5  ;;  %2020 = vmatpush3.bf16.msra.mxu1 %v2225_v6 }
  0x68   : > { %2009 = vmatprep.subr.bf16.mxu0 %v2426_v0  ;;  %2021 = vmatprep.subr.bf16.mxu1 %v2426_v0 }
  0x6b   : > { %2010 = vmatpush3.bf16.msra.mxu0 %v2226_v7  ;;  %2022 = vmatpush3.bf16.msra.mxu1 %v2227_v9 }
  0x6c   : > { %2027 = vmatprep.subr.bf16.mxu0 %v2426_v0  ;;  %2039 = vmatprep.subr.bf16.mxu1 %v2426_v0 }
  0x6e   : > { %2012 = vmatmul.mubr.msk.bf16.vlgmr.msra.gmra.mxu0 %vm540_vm1, %v496_v12  ;;  %2024 = vmatmul.mubr.msk.bf16.vlgmr.msra.gmra.mxu1 %vm540_vm1, %v498_v13 }
  0x6f   : > { %2028 = vmatpush3.bf16.msra.mxu0 %v2228_v11  ;;  %2035 = vmatprep.mubr.msk.bf16.mxu0 %vm2427_vm0, %v2426_v0 }
  0x70   : > { %2029 = vmatprep.subr.bf16.mxu0 %v2426_v0  ;;  %2041 = vmatprep.mubr.msk.bf16.mxu1 %vm2427_vm0, %v2426_v0 }
  0x73   : > { %2030 = vmatpush3.bf16.msra.mxu0 %v2229_v14 }
  0x74   : > { %2031 = vmatprep.subr.bf16.mxu0 %v2426_v0 }
  0x77   : > { %2032 = vmatpush3.bf16.msra.mxu0 %v2230_v15 }
  0x78   : > { %2033 = vmatprep.subr.bf16.mxu0 %v2426_v0 }
  0x7b   : > { %2034 = vmatpush3.bf16.msra.mxu0 %v2231_v16 }
  0x7c   : > { %2063 = vmatprep.subr.bf16.mxu0 %v2426_v0 }
  0x7e   : > { %2036 = vmatmul.mubr.msk.bf16.vlgmr.msra.gmra.mxu0 %vm540_vm1, %v500_v18 }
  0x7f   : > { %2065 = vmatprep.mubr.msk.bf16.mxu0 %vm2427_vm0, %v2426_v0 }
 0x12e   : > { %v578_v21 = vpop.f32.mrf.mxu0  ;;  %v661_v23 = vpop.f32.mrf.mxu1 }
 0x12f   : > { %v579_v22 = vadd.f32 %v1896_v19, %v578_v21  ;;  %v662_v24 = vadd.f32 %v1902_v20, %v661_v23 }
 0x130   : > { %v2013_v25 = vpop.f32.mrf.mxu0  ;;  %v2025_v27 = vpop.f32.mrf.mxu1 }
 0x131   : > { %v584_v26 = vmul.f32 0.35355338, %v579_v22  ;;  %v750_v28 = vpack.c.bf16 %v662_v24, %v662_v24 }
 0x132   : > { %v581_v29 = vpop.f32.mrf.mxu0  ;;  %v664_v31 = vpop.f32.mrf.mxu1 }
 0x133   : > { %v749_v30 = vpack.c.bf16 %v584_v26, %v584_v26  ;;  %v2752_v32 = vsel %vm752_vm2, %v750_v28, 0 }
 0x134   : > { %v2014_v33 = vpop.f32.mrf.mxu0  ;;  %v2026_v34 = vpop.f32.mrf.mxu1  ;;  %2040 = vmatpush3.bf16.xpose.msra.mxu1 %v2752_v32  ;;  %2064 = vmatpush3.bf16.xpose.msra.mxu0 %v2752_v32 }
 0x135   : > { %860 = vrot.lane.b32.xlu1 %v749_v30, %s2428_s27  ;;  %2075 = vmatprep.subr.bf16.mxu0 %v2426_v0 }
 0x136   : > { %2045 = vmatprep.subr.bf16.mxu1 %v2426_v0 }
 0x139   : > { %962 = vrot.lane.b32.xlu1 %v749_v30, %s2429_s16  ;;  %s2441_s16 = smov 56  }
 0x13b   : > { %2042 = vmatmul.mubr.msk.bf16.vlgmr.msra.gmra.mxu1 %vm752_vm2, %v749_v30 }
 0x13c   : > { %2047 = vmatprep.mubr.msk.bf16.mxu1 %vm2427_vm0, %v2426_v0 }
 0x13d   : > { %1169 = vrot.lane.b32.xlu1 %v750_v28, %s2428_s27 }
 0x13e   : > { %v743_v36 = vpop.f32.mrf.mxu0 }
 0x13f   : > { %v744_v37 = vadd.f32 %v1908_v35, %v743_v36 }
 0x140   : > { %v2037_v38 = vpop.f32.mrf.mxu0 }
 0x141   : > { %1166 = vrot.lane.b32.xlu1 %v749_v30, %s2430_s19  ;;  %v2766_v39 = vpack.c.bf16 %v744_v37, %v744_v37  ;;  %s1950_s19 = sshll.u32 %s2531_s25, 10 }
 0x142   : > { %v746_v40 = vpop.f32.mrf.mxu0  ;;  %s2903_s18 = scalar_lea.hbm %s2995_s12, %s1950_s19 }
 0x143   : > { %v2770_v41 = vsel %vm815_vm3, %v2766_v39, 0 }
 0x144   : > { %v2038_v42 = vpop.f32.mrf.mxu0  ;;  %2046 = vmatpush3.bf16.msra.mxu1 %v2770_v41 }
 0x145   : > { %1280 = vrot.lane.b32.xlu1 %v749_v30, %s2431_s21  ;;  %2051 = vmatprep.subr.bf16.mxu1 %v2426_v0  ;;  %s2438_s21 = smov 32  }
 0x149   : > { %1382 = vrot.lane.b32.xlu1 %v749_v30, %s2432_s29 }
 0x14d   : > { %1484 = vrot.lane.b32.xlu1 %v749_v30, %s2433_s30 }
 0x1a7   : > { %v861_v43 = vpop.permute.xlu1 %860 }
 0x1ab   : > { %v963_v44 = vpop.permute.xlu1 %962 }
 0x1ac   : > { %2066 = vmatmul.mubr.msk.bf16.vlgmr.msra.gmra.mxu0 %vm752_vm2, %v963_v44 }
 0x1ad   : > { %2076 = vmatpush3.bf16.xpose.msra.mxu0 %v2752_v32  ;;  %2077 = vmatprep.mubr.msk.bf16.mxu0 %vm2427_vm0, %v2426_v0 }
 0x1ae   : > { %2087 = vmatprep.subr.bf16.mxu0 %v2426_v0 }
 0x1af   : > { %v1170_v61 = vpop.permute.xlu1 %1169 }
 0x1b0   : > { %v1175_v63 = vsel %vm752_vm2, %v1170_v61, 0 }
 0x1b3   : > { %v1167_v1 = vpop.permute.xlu1 %1166 }
 0x1b7   : > { %v1281_v5 = vpop.permute.xlu1 %1280 }
 0x1bb   : > { %v1383_v6 = vpop.permute.xlu1 %1382 }
 0x1bf   : > { %v1485_v7 = vpop.permute.xlu1 %1484 }
 0x1fb   : > { %v793_v45 = vpop.f32.mrf.mxu1 }
 0x1fc   : > { %v799_v46 = vsel %vm752_vm2, %v793_v45, -inf }
 0x1fd   : > { %800 = vmax.xlane.f32.xlu0 %v799_v46  ;;  %v2043_v47 = vpop.f32.mrf.mxu1 }
 0x1ff   : > { %v796_v48 = vpop.f32.mrf.mxu1 }
 0x201   : > { %v2044_v49 = vpop.f32.mrf.mxu1 }
 0x26c   : > { %v2780_v50 = vpop.f32.mrf.mxu0 }
 0x26d   : > { %v1007_v59 = vsel %vm752_vm2, %v2780_v50, -inf }
 0x26e   : > { %v2067_v51 = vpop.f32.mrf.mxu0 }
 0x270   : > { %v1004_v52 = vpop.f32.mrf.mxu0 }
 0x272   : > { %v2068_v53 = vpop.f32.mrf.mxu0 }
 0x286   : > { %v801_v54 = vpop.xlane.xlu0 %800 }
 0x287   : > { %v802_v55 = vsub.f32 %v793_v45, %v801_v54 }
 0x289   : > { %v803_v56 = vmul.f32 1.442695, %v802_v55 }
 0x28b   : > { %2236 = vpow2.f32 %v803_v56 }
 0x298   : > { %v2237_v57 = vpop.eup %2236 }
 0x299   : > { %v805_v58 = vsel %vm752_vm2, %v2237_v57, 0.0 }
 0x29a   : > { %806 = vadd.xlane.f32.xlu0 %v805_v58 }
 0x2b0   : > { %1064 = vrot.lane.b32.xlu0 %v749_v30, %s2434_s17  ;;  %s2439_s17 = smov 40  }
 0x2cf   : > { %1008 = vmax.xlane.f32.xlu0 %v1007_v59 }
 0x323   : > { %v807_v60 = vpop.xlane.xlu0 %806 }
 0x324   : > { %2238 = vrcp.f32 %v807_v60 }
 0x327   : > { %v1065_v62 = vpop.permute.xlu0 %1064 }
 0x328   : > { %2078 = vmatmul.mubr.msk.bf16.vlgmr.msra.gmra.mxu0 %vm752_vm2, %v1065_v62 }
 0x329   : > { %2088 = vmatpush3.bf16.xpose.msra.mxu0 %v1175_v63  ;;  %2089 = vmatprep.mubr.msk.bf16.mxu0 %vm2427_vm0, %v2426_v0 }
 0x32a   : > { %2099 = vmatprep.subr.bf16.mxu0 %v2426_v0 }
 0x330   : > { %2090 = vmatmul.mubr.msk.bf16.vlgmr.msra.gmra.mxu0 %vm752_vm2, %v1167_v1 }
 0x331   : > { %v2239_v2 = vpop.eup %2238  ;;  %2100 = vmatpush3.bf16.xpose.msra.mxu0 %v1175_v63  ;;  %2101 = vmatprep.mubr.msk.bf16.mxu0 %vm2427_vm0, %v2426_v0 }
 0x332   : > { %v809_v3 = vmul.f32 %v2239_v2, %v2237_v57  ;;  %2111 = vmatprep.subr.bf16.mxu0 %v2426_v0 }
 0x334   : > { %810 = vst.msk [vmem:[%s2795_s14] sm:$0xff] %vm752_vm2, %v809_v3  ;;  %v811_v4 = vpack.c.bf16 %v809_v3, %v809_v3 }
 0x336   : > { %2048 = vmatmul.mubr.msk.bf16.vlgmr.msra.gmra.mxu1 %vm752_vm2, %v811_v4 }
 0x337   : > { %2052 = vmatpush3.bf16.xpose.msra.mxu1 %v2752_v32  ;;  %2053 = vmatprep.mubr.msk.bf16.mxu1 %vm2427_vm0, %v2426_v0 }
 0x338   : > { %2102 = vmatmul.mubr.msk.bf16.vlgmr.msra.gmra.mxu0 %vm752_vm2, %v1281_v5  ;;  %2057 = vmatprep.subr.bf16.mxu1 %v2426_v0 }
 0x339   : > { %2112 = vmatpush3.bf16.xpose.msra.mxu0 %v1175_v63  ;;  %2113 = vmatprep.mubr.msk.bf16.mxu0 %vm2427_vm0, %v2426_v0 }
 0x33a   : > { %2123 = vmatprep.subr.bf16.mxu0 %v2426_v0 }
 0x33e   : > { %2054 = vmatmul.mubr.msk.bf16.vlgmr.msra.gmra.mxu1 %vm752_vm2, %v861_v43 }
 0x33f   : > { %2058 = vmatpush3.bf16.msra.mxu1 %v2770_v41  ;;  %2059 = vmatprep.mubr.msk.bf16.mxu1 %vm2427_vm0, %v2426_v0 }
 0x340   : > { %2114 = vmatmul.mubr.msk.bf16.vlgmr.msra.gmra.mxu0 %vm752_vm2, %v1383_v6  ;;  %2069 = vmatprep.subr.bf16.mxu1 %v2426_v0 }
 0x341   : > { %2124 = vmatpush3.bf16.xpose.msra.mxu0 %v1175_v63  ;;  %2125 = vmatprep.mubr.msk.bf16.mxu0 %vm2427_vm0, %v2426_v0 }
 0x342   : > { %2135 = vmatprep.subr.bf16.mxu0 %v2426_v0 }
 0x348   : > { %2126 = vmatmul.mubr.msk.bf16.vlgmr.msra.gmra.mxu0 %vm752_vm2, %v1485_v7 }
 0x349   : > { %2143 = vmatprep.mubr.msk.bf16.mxu0 %vm2427_vm0, %v2426_v0 }
 0x358   : > { %v1009_v14 = vpop.xlane.xlu0 %1008 }
 0x359   : > { %v1010_v17 = vsub.f32 %v2780_v50, %v1009_v14 }
 0x35b   : > { %v1011_v22 = vmul.f32 1.442695, %v1010_v17 }
 0x35d   : > { %2240 = vpow2.f32 %v1011_v22 }
 0x36a   : > { %v2241_v44 = vpop.eup %2240 }
 0x36b   : > { %v1013_v47 = vsel %vm752_vm2, %v2241_v44, 0.0 }
 0x3e8   : > { %v1103_v8 = vpop.f32.mrf.mxu0 }
 0x3e9   : > { %v1109_v9 = vsel %vm752_vm2, %v1103_v8, -inf }
 0x3ea   : > { %1110 = vmax.xlane.f32.xlu0 %v1109_v9  ;;  %v2079_v10 = vpop.f32.mrf.mxu0 }
 0x3ec   : > { %v1106_v11 = vpop.f32.mrf.mxu0 }
 0x3ee   : > { %v2080_v12 = vpop.f32.mrf.mxu0 }
 0x3f0   : > { %v1211_v13 = vpop.f32.mrf.mxu0 }
 0x3f1   : > { %v1217_v35 = vsel %vm752_vm2, %v1211_v13, -inf }
 0x3f2   : > { %v2091_v15 = vpop.f32.mrf.mxu0 }
 0x3f4   : > { %v1214_v16 = vpop.f32.mrf.mxu0 }
 0x3f6   : > { %v2822_v18 = vpop.f32.mrf.mxu1  ;;  %v2092_v19 = vpop.f32.mrf.mxu0 }
 0x3f8   : > { %v2049_v20 = vpop.f32.mrf.mxu1  ;;  %v1319_v21 = vpop.f32.mrf.mxu0 }
 0x3f9   : > { %v1325_v23 = vsel %vm752_vm2, %v1319_v21, -inf }
 0x3fa   : > { %v856_v24 = vpop.f32.mrf.mxu1  ;;  %1326 = vmax.xlane.f32.xlu0 %v1325_v23  ;;  %v2103_v25 = vpop.f32.mrf.mxu0 }
 0x3fc   : > { %v2050_v26 = vpop.f32.mrf.mxu1  ;;  %v1322_v27 = vpop.f32.mrf.mxu0 }
 0x3fe   : > { %v899_v28 = vpop.f32.mrf.mxu1  ;;  %v2104_v29 = vpop.f32.mrf.mxu0 }
 0x3ff   : > { %v905_v30 = vsel %vm752_vm2, %v899_v28, -inf }
 0x400   : > { %906 = vmax.xlane.f32.xlu1 %v905_v30  ;;  %v2055_v31 = vpop.f32.mrf.mxu1  ;;  %v1421_v32 = vpop.f32.mrf.mxu0 }
 0x401   : > { %v1427_v40 = vsel %vm752_vm2, %v1421_v32, -inf }
 0x402   : > { %v902_v33 = vpop.f32.mrf.mxu1  ;;  %v2115_v34 = vpop.f32.mrf.mxu0 }
 0x404   : > { %v2056_v36 = vpop.f32.mrf.mxu1  ;;  %1218 = vmax.xlane.f32.xlu1 %v1217_v35  ;;  %v1424_v37 = vpop.f32.mrf.mxu0 }
 0x406   : > { %v2116_v38 = vpop.f32.mrf.mxu0 }
 0x408   : > { %1428 = vmax.xlane.f32.xlu1 %v1427_v40  ;;  %v1523_v42 = vpop.f32.mrf.mxu0 }
 0x409   : > { %v1529_v43 = vsel %vm752_vm2, %v1523_v42, -inf }
 0x40a   : > { %1530 = vmax.xlane.f32.xlu0 %v1529_v43  ;;  %v2127_v45 = vpop.f32.mrf.mxu0 }
 0x40c   : > { %v1526_v46 = vpop.f32.mrf.mxu0 }
 0x40e   : > { %1014 = vadd.xlane.f32.xlu0 %v1013_v47  ;;  %v2128_v48 = vpop.f32.mrf.mxu0 }
 0x473   : > { %v1111_v49 = vpop.xlane.xlu0 %1110 }
 0x474   : > { %v1112_v50 = vsub.f32 %v1103_v8, %v1111_v49 }
 0x476   : > { %v1113_v54 = vmul.f32 1.442695, %v1112_v50 }
 0x483   : > { %v1327_v51 = vpop.xlane.xlu0 %1326 }
 0x484   : > { %v1328_v55 = vsub.f32 %v1319_v21, %v1327_v51 }
 0x486   : > { %v1329_v59 = vmul.f32 1.442695, %v1328_v55 }
 0x489   : > { %v907_v52 = vpop.xlane.xlu1 %906 }
 0x48a   : > { %v908_v53 = vsub.f32 %v899_v28, %v907_v52 }
 0x48c   : > { %v909_v56 = vmul.f32 1.442695, %v908_v53 }
 0x48d   : > { %v1219_v57 = vpop.xlane.xlu1 %1218 }
 0x48e   : > { %2242 = vpow2.f32 %v909_v56  ;;  %v1220_v58 = vsub.f32 %v1211_v13, %v1219_v57 }
 0x48f   : > { %2244 = vpow2.f32 %v1113_v54 }
 0x490   : > { %v1221_v60 = vmul.f32 1.442695, %v1220_v58  ;;  %v2232_v58 = vld [vmem:[%s2992_s9 + $0x18] sm:$0xff]  }
 0x491   : > { %v1429_v61 = vpop.xlane.xlu1 %1428  ;;  %2136 = vmatpush3.bf16.msra.mxu0 %v2232_v58 }
 0x492   : > { %2246 = vpow2.f32 %v1221_v60  ;;  %v1430_v62 = vsub.f32 %v1421_v32, %v1429_v61  ;;  %2137 = vmatprep.subr.bf16.mxu0 %v2426_v0 }
 0x493   : > { %v1531_v63 = vpop.xlane.xlu0 %1530  ;;  %2248 = vpow2.f32 %v1329_v59 }
 0x494   : > { %v1431_v1 = vmul.f32 1.442695, %v1430_v62  ;;  %v1532_v2 = vsub.f32 %v1523_v42, %v1531_v63  ;;  %v2233_v62 = vld [vmem:[%s2992_s9 + $0x10] sm:$0xff]  }
 0x495   : > { %2138 = vmatpush3.bf16.msra.mxu0 %v2233_v62 }
 0x496   : > { %2250 = vpow2.f32 %v1431_v1  ;;  %v1533_v3 = vmul.f32 1.442695, %v1532_v2  ;;  %v2234_v1 = vld [vmem:[%s2992_s9 + $0x8] sm:$0xff]   ;;  %2139 = vmatprep.subr.bf16.mxu0 %v2426_v0 }
 0x497   : > { %v1015_v4 = vpop.xlane.xlu0 %1014 }
 0x498   : > { %2252 = vpow2.f32 %v1533_v3 }
 0x499   : > { %2254 = vrcp.f32 %v1015_v4  ;;  %2140 = vmatpush3.bf16.msra.mxu0 %v2234_v1 }
 0x49a   : > { %2141 = vmatprep.subr.bf16.mxu0 %v2426_v0 }
 0x49b   : > { %v2243_v5 = vpop.eup %2242 }
 0x49c   : > { %v911_v6 = vsel %vm752_vm2, %v2243_v5, 0.0  ;;  %v2245_v7 = vpop.eup %2244 }
 0x49d   : > { %912 = vadd.xlane.f32.xlu1 %v911_v6  ;;  %v1115_v9 = vsel %vm752_vm2, %v2245_v7, 0.0 }
 0x49f   : > { %v2247_v8 = vpop.eup %2246 }
 0x4a0   : > { %v1223_v10 = vsel %vm752_vm2, %v2247_v8, 0.0  ;;  %v2249_v11 = vpop.eup %2248 }
 0x4a1   : > { %1116 = vadd.xlane.f32.xlu1 %v1115_v9  ;;  %1224 = vadd.xlane.f32.xlu0 %v1223_v10  ;;  %v1331_v13 = vsel %vm752_vm2, %v2249_v11, 0.0 }
 0x4a3   : > { %v2251_v12 = vpop.eup %2250 }
 0x4a4   : > { %v1433_v14 = vsel %vm752_vm2, %v2251_v12, 0.0 }
 0x4a5   : > { %v2253_v15 = vpop.eup %2252  ;;  %1332 = vadd.xlane.f32.xlu1 %v1331_v13  ;;  %1434 = vadd.xlane.f32.xlu0 %v1433_v14 }
 0x4a6   : > { %v2255_v16 = vpop.eup %2254  ;;  %v1535_v19 = vsel %vm752_vm2, %v2253_v15, 0.0 }
 0x4a7   : > { %v1017_v17 = vmul.f32 %v2255_v16, %v2241_v44 }
 0x4a9   : > { %1536 = vadd.xlane.f32.xlu1 %v1535_v19  ;;  %1920 = vst.msk [vmem:[%s2795_s14 + $0x10] sm:$0xff] %vm752_vm2, %v1017_v17  ;;  %v1020_v36 = vpack.c.bf16 %v1017_v17, %v1017_v17 }
 0x4bb   : > { %1232 = vrot.lane.b32.xlu0 %v2766_v39, %s2428_s27  ;;  %s2437_s27 = smov 24  }
 0x526   : > { %v913_v20 = vpop.xlane.xlu1 %912 }
 0x527   : > { %2256 = vrcp.f32 %v913_v20 }
 0x52a   : > { %v1117_v21 = vpop.xlane.xlu1 %1116  ;;  %v1225_v22 = vpop.xlane.xlu0 %1224 }
 0x52b   : > { %2258 = vrcp.f32 %v1117_v21 }
 0x52c   : > { %2260 = vrcp.f32 %v1225_v22 }
 0x52e   : > { %v1333_v23 = vpop.xlane.xlu1 %1332  ;;  %v1435_v24 = vpop.xlane.xlu0 %1434 }
 0x52f   : > { %2262 = vrcp.f32 %v1333_v23 }
 0x530   : > { %2264 = vrcp.f32 %v1435_v24 }
 0x532   : > { %v1537_v25 = vpop.xlane.xlu1 %1536  ;;  %v1233_v40 = vpop.permute.xlu0 %1232 }
 0x533   : > { %2266 = vrcp.f32 %v1537_v25  ;;  %v1238_v43 = vsel %vm815_vm3, %v1233_v40, 0 }
 0x534   : > { %v2257_v26 = vpop.eup %2256 }
 0x535   : > { %v915_v27 = vmul.f32 %v2257_v26, %v2243_v5  ;;  %v2235_v5 = vld [vmem:[%s2992_s9] sm:$0xff]  }
 0x536   : > { %2142 = vmatpush3.bf16.msra.mxu0 %v2235_v5 }
 0x537   : > { %1917 = vst.msk [vmem:[%s2795_s14 + $0x8] sm:$0xff] %vm752_vm2, %v915_v27  ;;  %v918_v28 = vpack.c.bf16 %v915_v27, %v915_v27 }
 0x538   : > { %v2259_v39 = vpop.eup %2258 }
 0x539   : > { %v2261_v29 = vpop.eup %2260  ;;  %2060 = vmatmul.mubr.msk.bf16.vlgmr.msra.gmra.mxu1 %vm752_vm2, %v918_v28  ;;  %v1119_v30 = vmul.f32 %v2259_v39, %v2245_v7 }
 0x53a   : > { %2070 = vmatpush3.bf16.msra.mxu1 %v2770_v41  ;;  %2071 = vmatprep.mubr.msk.bf16.mxu1 %vm2427_vm0, %v2426_v0  ;;  %v1227_v31 = vmul.f32 %v2261_v29, %v2247_v8 }
 0x53b   : > { %2081 = vmatprep.subr.bf16.mxu1 %v2426_v0  ;;  %1923 = vst.msk [vmem:[%s2795_s14 + $0x18] sm:$0xff] %vm752_vm2, %v1119_v30  ;;  %v1122_v42 = vpack.c.bf16 %v1119_v30, %v1119_v30 }
 0x53c   : > { %v2263_v32 = vpop.eup %2262  ;;  %1926 = vst.msk [vmem:[%s2795_s14 + $0x20] sm:$0xff] %vm752_vm2, %v1227_v31 }
 0x53d   : > { %v2265_v33 = vpop.eup %2264  ;;  %v1335_v34 = vmul.f32 %v2263_v32, %v2249_v11 }
 0x53e   : > { %v1437_v35 = vmul.f32 %v2265_v33, %v2251_v12 }
 0x53f   : > { %1929 = vst.msk [vmem:[%s2795_s14 + $0x28] sm:$0xff] %vm752_vm2, %v1335_v34  ;;  %v1338_v44 = vpack.c.bf16 %v1335_v34, %v1335_v34 }
 0x540   : > { %v2267_v37 = vpop.eup %2266  ;;  %1932 = vst.msk [vmem:[%s2795_s14 + $0x30] sm:$0xff] %vm752_vm2, %v1437_v35  ;;  %v1440_v45 = vpack.c.bf16 %v1437_v35, %v1437_v35 }
 0x541   : > { %2072 = vmatmul.mubr.msk.bf16.vlgmr.msra.gmra.mxu1 %vm752_vm2, %v1020_v36  ;;  %v1539_v38 = vmul.f32 %v2267_v37, %v2253_v15 }
 0x542   : > { %2082 = vmatpush3.bf16.msra.mxu1 %v2770_v41  ;;  %2083 = vmatprep.mubr.msk.bf16.mxu1 %vm2427_vm0, %v2426_v0  ;;  %v1230_v41 = vpack.c.bf16 %v1227_v31, %v1227_v31 }
 0x543   : > { %2093 = vmatprep.subr.bf16.mxu1 %v2426_v0  ;;  %1935 = vst.msk [vmem:[%s2795_s14 + $0x38] sm:$0xff] %vm752_vm2, %v1539_v38  ;;  %v1542_v46 = vpack.c.bf16 %v1539_v38, %v1539_v38 }
 0x549   : > { %2084 = vmatmul.mubr.msk.bf16.vlgmr.msra.gmra.mxu1 %vm752_vm2, %v1122_v42 }
 0x54a   : > { %2094 = vmatpush3.bf16.msra.mxu1 %v1238_v43  ;;  %2095 = vmatprep.mubr.msk.bf16.mxu1 %vm2427_vm0, %v2426_v0 }
 0x54b   : > { %2105 = vmatprep.subr.bf16.mxu1 %v2426_v0 }
 0x551   : > { %2096 = vmatmul.mubr.msk.bf16.vlgmr.msra.gmra.mxu1 %vm752_vm2, %v1230_v41 }
 0x552   : > { %2106 = vmatpush3.bf16.msra.mxu1 %v1238_v43  ;;  %2107 = vmatprep.mubr.msk.bf16.mxu1 %vm2427_vm0, %v2426_v0 }
 0x553   : > { %2117 = vmatprep.subr.bf16.mxu1 %v2426_v0 }
 0x559   : > { %2108 = vmatmul.mubr.msk.bf16.vlgmr.msra.gmra.mxu1 %vm752_vm2, %v1338_v44 }
 0x55a   : > { %2118 = vmatpush3.bf16.msra.mxu1 %v1238_v43  ;;  %2119 = vmatprep.mubr.msk.bf16.mxu1 %vm2427_vm0, %v2426_v0 }
 0x55b   : > { %2129 = vmatprep.subr.bf16.mxu1 %v2426_v0 }
 0x561   : > { %2120 = vmatmul.mubr.msk.bf16.vlgmr.msra.gmra.mxu1 %vm752_vm2, %v1440_v45 }
 0x562   : > { %2130 = vmatpush3.bf16.msra.mxu1 %v1238_v43  ;;  %2131 = vmatprep.mubr.msk.bf16.mxu1 %vm2427_vm0, %v2426_v0 }
 0x569   : > { %2132 = vmatmul.mubr.msk.bf16.vlgmr.msra.gmra.mxu1 %vm752_vm2, %v1542_v46 }
 0x5f9   : > { %v956_v47 = vpop.f32.mrf.mxu1 }
 0x5fa   : > { %1587 = vrot.lane.b32.xlu1 %v956_v47, %s2435_s1 }
 0x5fb   : > { %v2061_v48 = vpop.f32.mrf.mxu1 }
 0x5fd   : > { %v959_v49 = vpop.f32.mrf.mxu1 }
 0x5ff   : > { %v2062_v50 = vpop.f32.mrf.mxu1 }
 0x601   : > { %v1058_v51 = vpop.f32.mrf.mxu1 }
 0x602   : > { %1591 = vrot.lane.b32.xlu1 %v1058_v51, %s2436_s23  ;;  %s2328_s23 = sshll.u32 %s2442_s13, 4  ;;  %s2329_s23 = int_to_ptr.vmem [resolvable:$false] %s2328_s23 }
 0x603   : > { %v2073_v52 = vpop.f32.mrf.mxu1 }
 0x605   : > { %v1061_v53 = vpop.f32.mrf.mxu1 }
 0x607   : > { %v2074_v54 = vpop.f32.mrf.mxu1 }
 0x609   : > { %v1160_v55 = vpop.f32.mrf.mxu1 }
 0x60a   : > { %1595 = vrot.lane.b32.xlu0 %v1160_v55, %s2437_s27  ;;  %s2440_s27 = smov 48  }
 0x60b   : > { %v2085_v56 = vpop.f32.mrf.mxu1 }
 0x60d   : > { %v1163_v57 = vpop.f32.mrf.mxu1 }
 0x60f   : > { %v2086_v59 = vpop.f32.mrf.mxu1 }
 0x611   : > { %v1274_v60 = vpop.f32.mrf.mxu1 }
 0x612   : > { %1599 = vrot.lane.b32.xlu1 %v1274_v60, %s2438_s21  ;;  %s1743_s21 = sshll.u32 %s2795_s14, 4  ;;  %s2330_s14 = scalar_lea.vmem %s2329_s23, 2048  ;;  %s2905_s21 = int_to_ptr.vmem [resolvable:$true] %s1743_s21 }
 0x613   : > { %v2097_v61 = vpop.f32.mrf.mxu1  ;;  %p2331_p2 = scmp.lt.s32.totalorder %s2905_s21, %s2329_s23 }
 0x615   : > { %v1277_v63 = vpop.f32.mrf.mxu1 }
 0x617   : > { %v2098_v2 = vpop.f32.mrf.mxu1 }
 0x619   : > { %v1376_v3 = vpop.f32.mrf.mxu1 }
 0x61a   : > { %1603 = vrot.lane.b32.xlu0 %v1376_v3, %s2439_s17  ;;  %s2324_s17 = scalar_lea.vmem %s2905_s21, 1024 }
 0x61b   : > { %v2109_v4 = vpop.f32.mrf.mxu1  ;;  %p2325_p3 = scmp.ne.s32.totalorder %s2905_s21, %s2324_s17  ;;  %p2332_p4 = scmp.lt.s32.totalorder %s2330_s14, %s2324_s17 }
 0x61d   : > { %v1379_v6 = vpop.f32.mrf.mxu1  ;;  %p2326_p8 = pnand %p2325_p3, %p3024_p7  ;;  %p2333_p5 = por %p2332_p4, %p2331_p2 }
 0x61f   : > { %v2110_v7 = vpop.f32.mrf.mxu1  ;;  %p2327_p10 = pneg %p2326_p8 }
 0x621   : > { %v1478_v8 = vpop.f32.mrf.mxu1  ;;  %p2334_p9 = pnand %p2333_p5, %p2327_p10 }
 0x622   : > { %1607 = vrot.lane.b32.xlu1 %v1478_v8, %s2440_s27 }
 0x623   : > { %v2121_v9 = vpop.f32.mrf.mxu1 }
 0x625   : > { %v1481_v10 = vpop.f32.mrf.mxu1 }
 0x627   : > { %v2122_v11 = vpop.f32.mrf.mxu1 }
 0x629   : > { %v1580_v12 = vpop.f32.mrf.mxu1 }
 0x62a   : > { %1611 = vrot.lane.b32.xlu0 %v1580_v12, %s2441_s16 }
 0x62b   : > { %v2133_v13 = vpop.f32.mrf.mxu1 }
 0x62d   : > { %v1583_v14 = vpop.f32.mrf.mxu1 }
 0x62f   : > { %v2134_v15 = vpop.f32.mrf.mxu1 }
 0x66c   : > { %v1588_v0 = vpop.permute.xlu1 %1587 }
 0x66d   : > { %v1614_v20 = vsel %vm752_vm2, %v2822_v18, %v1588_v0 }
 0x674   : > { %v1592_v16 = vpop.permute.xlu1 %1591 }
 0x675   : > { %v1616_v21 = vsel %vm1615_vm4, %v1614_v20, %v1592_v16 }
 0x67c   : > { %v1596_v17 = vpop.permute.xlu0 %1595 }
 0x67d   : > { %v1618_v23 = vsel %vm1617_vm5, %v1616_v21, %v1596_v17 }
 0x684   : > { %v1600_v19 = vpop.permute.xlu1 %1599 }
 0x685   : > { %v1620_v25 = vsel %vm1619_vm6, %v1618_v23, %v1600_v19 }
 0x68c   : > { %v1604_v22 = vpop.permute.xlu0 %1603 }
 0x68d   : > { %v1622_v26 = vsel %vm1621_vm7, %v1620_v25, %v1604_v22 }
 0x694   : > { %v1608_v24 = vpop.permute.xlu1 %1607 }
 0x695   : > { %v1624_v27 = vsel %vm1623_vm8, %v1622_v26, %v1608_v24 }
 0x69c   : > { %v1612_v28 = vpop.permute.xlu0 %1611 }
 0x69d   : > { %v1626_v39 = vsel %vm1625_vm9, %v1624_v27, %v1612_v28 }
 0x69e   : > { %v1627_v29 = vpack.c.bf16 %v1626_v39, %v1626_v39 }
 0x6a0   : > { %2144 = vmatmul.mubr.msk.bf16.vlgmr.msra.gmra.mxu0 %vm540_vm1, %v1627_v29 }
 0x6a1   : > { %2337 = shalt.err (!%p2334_p9)
}
 0x6a2   : > { %s2338_s27 = scalar_lea.hbm %s2903_s18, 1024  ;;  %s2342_s29 = scalar_lea.hbm %s2995_s12, 2048 }
 0x6a3   : > { %p2339_p0 = scmp.ne.s32.totalorder %s2903_s18, %s2338_s27  ;;  %p2343_p1 = scmp.lt.s32.totalorder %s2903_s18, %s2995_s12 }
 0x6a4   : > { %p2344_p6 = scmp.lt.s32.totalorder %s2342_s29, %s2338_s27 }
 0x6a5   : > { %p2340_p11 = pnand %p2339_p0, %p3024_p7 }
 0x6a6   : > { %p2345_p13 = por %p2344_p6, %p2343_p1 }
 0x6a7   : > { %p2341_p12 = pneg %p2340_p11 }
 0x6a9   : > { %p2346_p3 = pnand %p2345_p13, %p2341_p12 }
 0x6ab   : > { %2349 = shalt.err (!%p2346_p3)
}
 0x6ac   : > { %s2443_s17 = smov 128   ;;  %v1937_v18 = vld [vmem:[%s2993_s10] ss:$0 sm:$0xff]  ;;  %s1945_s27 = sshll.u32 %s2531_s25, 7 }
 0x6ad   : > { %2152 = dma.vmem_to_hbm [thread:$0]  (%p3024_p7), %s2905_s21, 1024, %s2903_s18, %s1717_s26, %s2443_s17, %s2443_s17, %s2435_s1  }
 0x6ae   : > { %s482_s16 = scalar_lea.vmem [#allocation7], %s2659_s20  ;;  %s2939_s13 = scalar_lea.hbm %s2994_s11, %s1945_s27 }
 0x6af   : > { %s1730_s19 = sshll.u32 %s482_s16, 4  ;;  %s1712_s1 = scalar_lea.sflag [#allocation4], %s2656_s28  ;;  %s2941_s19 = int_to_ptr.vmem [resolvable:$true] %s1730_s19 }
 0x6b0   : > { %s2350_s25 = scalar_lea.vmem %s2941_s19, 128  ;;  %s2444_s20 = smov [#allocation7]  }
 0x6b1   : > { %p2351_p8 = scmp.ne.s32.totalorder %s2941_s19, %s2350_s25  ;;  %s2354_s21 = sshll.u32 %s2444_s20, 4  ;;  %s2355_s21 = int_to_ptr.vmem [resolvable:$false] %s2354_s21 }
 0x6b2   : > { %s2356_s18 = scalar_lea.vmem %s2355_s21, 256  ;;  %p2357_p4 = scmp.lt.s32.totalorder %s2941_s19, %s2355_s21 }
 0x6b3   : > { %p2352_p10 = pnand %p2351_p8, %p3024_p7  ;;  %p2358_p5 = scmp.lt.s32.totalorder %s2356_s18, %s2350_s25 }
 0x6b5   : > { %p2353_p2 = pneg %p2352_p10  ;;  %p2359_p9 = por %p2358_p5, %p2357_p4 }
 0x6b7   : > { %p2360_p0 = pnand %p2359_p9, %p2353_p2 }
 0x760   : > { %v1704_v30 = vpop.f32.mrf.mxu0 }
 0x761   : > { %v1705_v31 = vadd.f32 %v1937_v18, %v1704_v30 }
 0x762   : > { %v2145_v32 = vpop.f32.mrf.mxu0 }
 0x763   : > { %1710 = vst.msk [vmem:[%s482_s16] sm:$0xff] %vm540_vm1, %v1705_v31 }
 0x764   : > { %v1707_v33 = vpop.f32.mrf.mxu0 }
 0x765   : > { %2363 = shalt.err (!%p2360_p0)
}
 0x766   : > { %s2364_s26 = scalar_lea.hbm %s2939_s13, 128  ;;  %s2368_s23 = scalar_lea.hbm %s2994_s11, 256 }
 0x767   : > { %p2365_p11 = scmp.ne.s32.totalorder %s2939_s13, %s2364_s26  ;;  %p2369_p6 = scmp.lt.s32.totalorder %s2939_s13, %s2994_s11 }
 0x768   : > { %p2370_p13 = scmp.lt.s32.totalorder %s2368_s23, %s2364_s26 }
 0x769   : > { %p2366_p12 = pnand %p2365_p11, %p3024_p7 }
 0x76a   : > { %p2371_p3 = por %p2370_p13, %p2369_p6 }
 0x76b   : > { %p2367_p1 = pneg %p2366_p12 }
 0x76d   : > { %p2372_p8 = pnand %p2371_p3, %p2367_p1 }
 0x76f   : > { %2375 = shalt.err (!%p2372_p8)
}
 0x770   : > { %2151 = dma.vmem_to_hbm [thread:$0]  (%p3024_p7), %s2941_s19, 128, %s2939_s13, %s1712_s1   ;;  %v2146_v34 = vpop.f32.mrf.mxu0 }
 0x771 PF: > { %s3025_s16 = sld [smem:[#allocation14_spill]]  ;;  %p3028_p2 = scmp.ge.s32.totalorder %s2422_s24, 2 }
 0x772   : > { %s3026_s29 = sld [smem:[#allocation18_spill]] }
 0x777   : > { %s1758_s30 = sand.u32 1, %s3025_s16  }
 0x778   : > { %p3027_p10 = scmp.ne.s32.totalorder %s3026_s29, 0  ;;  %s1759_s25 = scalar_lea.sflag [#allocation4], %s1758_s30 }
 0x77a   : > { %p2163_p4 = pnand %p3028_p2, %p3027_p10 }
 0x77c   : > { %p2164_p5 = pneg %p2163_p4 }
 0x77e   : > { %2401 = dma.done.wait (%p2164_p5), %s1759_s25, 128  }
 0x77f   : > { %2403 = vsyncadd (%p2164_p5), %s1759_s25, 4294967168  ;;  %s1768_s20 = scalar_lea.sflag [#allocation9], %s1758_s30 }
 0x780   : > { %2405 = dma.done.wait (%p2164_p5), %s1768_s20, 1024  }
 0x781   : > { %2407 = vsyncadd (%p2164_p5), %s1768_s20, 4294966272  ;;  %s3029_s24 = sld [smem:[#allocation16_spill]]  ;;  %s3032_s21 = smov %s2414_s22 }
 0x782   : > { %s3030_s15 = sld [smem:[#allocation15_spill]] }
 0x783   : > { %s3031_s23 = sld [smem:[#allocation17_spill]] }
 0x787   : > { %p32_p7 = scmp.ge.s32.totalorder %s3029_s24, 4  }
 0x788   : > { %s3033_s22 = smov %s3030_s15 }
 0x789   :  { %34 = sbr.rel (!%p32_p7) target bundleno = 11 (0xb), region = 149 }
 0x78e   :  { %1773 = vsyncpa [#allocation3], 1 }
 0x78f   :  { %1775 = vsyncpa [#allocation3 + $0x1], 1 }
 0x790   :  { %1776 = vsyncpa [#allocation6], 1 }
 0x791   :  { %1778 = vsyncpa [#allocation6 + $0x1], 1 }
 0x792   :  { %1779 = vsyncpa [#allocation4], 1 }
 0x793   :  { %1781 = vsyncpa [#allocation4 + $0x1], 1 }
 0x794   :  { %1782 = vsyncpa [#allocation9], 1 }
 0x795   :  { %1784 = vsyncpa [#allocation9 + $0x1], 1 }

</bundles_post_ra>
